<compile_context>
chip_gen: v5e
topology: v5e:2x2
jax: 0.10.0
libtpu: 0.0.40
codegen_flags: <defaults>
</compile_context>

<pallas_src>
import jax
import jax.numpy as jnp
from jax.experimental import pallas as pl
from jax.experimental.pallas import tpu as pltpu

# ---------------- small synthetic BERT config ----------------
VOCAB = 100
TYPE_VOCAB = 2
MAX_POS = 64
HIDDEN = 32
NUM_HEADS = 4
HEAD_DIM = HIDDEN // NUM_HEADS
INTERMEDIATE = 64
NUM_LAYERS = 2
NUM_LABELS = 4
LOGITS_PAD = 128          # lane-dense padded classifier width (sliced in wrapper)
OUT_SUBLANES = 8          # sublane-dense output tile height
LN_EPS = 1e-12


# ---------------- in-kernel helpers (pure jnp, traced inside the kernel) ----------------
def _layernorm(h, g, b):
    mu = jnp.mean(h, axis=-1, keepdims=True)
    var = jnp.mean((h - mu) * (h - mu), axis=-1, keepdims=True)
    return (h - mu) * jax.lax.rsqrt(var + LN_EPS) * g + b


def _gelu(y):
    # tanh-approx GELU (Mosaic-friendly).
    # TODO(synk): exact erf-based GELU to match HF hidden_act="gelu" bit-exactly.
    c = jnp.float32(0.7978845608028654)  # sqrt(2/pi)
    return 0.5 * y * (1.0 + jnp.tanh(c * (y + 0.044715 * y * y * y)))


def _bf16(t):
    # Cast MXU operands to bf16 (f32 accumulate via preferred_element_type).
    return t.astype(jnp.bfloat16)


# ---------------- the fused per-batch-element kernel ----------------
def _bert_fused_kernel(emb_ref, bias_ref,
                       emb_g_ref, emb_b_ref,
                       wqkv_ref, bqkv_ref, wo_ref, bo_ref,
                       ln1_g_ref, ln1_b_ref,
                       w1_ref, b1_ref, w2_ref, b2_ref,
                       ln2_g_ref, ln2_b_ref,
                       pool_w_ref, pool_b_ref,
                       cls_w_ref, cls_b_ref,
                       logits_ref):
    """One batch element per grid step: embeddings-LN -> encoder stack ->
    pooler -> classifier, all VMEM-resident."""
    scale = jnp.float32(1.0 / float(HEAD_DIM) ** 0.5)
    bias = bias_ref[0]                                    # (1, S) additive mask

    # Embedding LayerNorm (f32).
    x = _layernorm(emb_ref[0], emb_g_ref[...], emb_b_ref[...])     # (S, H)

    # Static unroll over 2 layers.
    # TODO(synk): at 12+ layers use a grid axis / fori_loop over stacked
    # weights so live ranges reset per layer (vreg pressure, compile time).
    for l in range(NUM_LAYERS):
        # ---- fused QKV projection: one bf16 MXU pass, lane width 3*H ----
        qkv = jnp.dot(_bf16(x), wqkv_ref[l],
                      preferred_element_type=jnp.float32) + bqkv_ref[l]  # (S, 3H)
        q = qkv[:, 0 * HIDDEN:1 * HIDDEN]
        k = qkv[:, 1 * HIDDEN:2 * HIDDEN]
        v = qkv[:, 2 * HIDDEN:3 * HIDDEN]

        # ---- head relayout done ONCE per tensor: (S, NH*HD) -> (NH, S, HD).
        # (Replaces the old per-head slice+reshape+einsum pattern; all heads
        #  then go through a single batched contraction.)
        def heads(t):
            return jnp.stack([t[:, h * HEAD_DIM:(h + 1) * HEAD_DIM]
                              for h in range(NUM_HEADS)], axis=0)
        qh, kh, vh = heads(q), heads(k), heads(v)

        # ---- all-head attention in one batched einsum pair ----
        s = jnp.einsum('nqd,nkd->nqk', _bf16(qh), _bf16(kh),
                       preferred_element_type=jnp.float32)           # (NH, S, S)
        s = s * scale + bias                                         # mask per key
        s = s - jnp.max(s, axis=-1, keepdims=True)
        p = jnp.exp(s)
        p = p * pl.reciprocal(jnp.sum(p, axis=-1, keepdims=True), approx=True)
        ctx = jnp.einsum('nqk,nkd->nqd', _bf16(p), _bf16(vh),
                         preferred_element_type=jnp.float32)         # (NH, S, HD)

        # ---- reassemble heads on the lane axis, ONE output projection ----
        ctx2d = jnp.concatenate([ctx[h] for h in range(NUM_HEADS)], axis=-1)  # (S, H)
        attn = jnp.dot(_bf16(ctx2d), wo_ref[l],
                       preferred_element_type=jnp.float32) + bo_ref[l]
        x = _layernorm(x + attn, ln1_g_ref[l], ln1_b_ref[l])

        # ---- feed-forward (bf16 at the dots, f32 elementwise) ----
        hmid = _gelu(jnp.dot(_bf16(x), w1_ref[l],
                             preferred_element_type=jnp.float32) + b1_ref[l])
        ffn = jnp.dot(_bf16(hmid), w2_ref[l],
                      preferred_element_type=jnp.float32) + b2_ref[l]
        x = _layernorm(x + ffn, ln2_g_ref[l], ln2_b_ref[l])

    # ---- pooler (tanh on the [CLS] = first token) + padded classifier ----
    cls_tok = x[0:1, :]                                              # (1, H), static slice
    pooled = jnp.tanh(jnp.dot(_bf16(cls_tok), pool_w_ref[...],
                              preferred_element_type=jnp.float32) + pool_b_ref[...])
    logits = jnp.dot(_bf16(pooled), cls_w_ref[...],
                     preferred_element_type=jnp.float32) + cls_b_ref[...]   # (1, 128)
    # Lane/sublane-dense store; wrapper slices row 0 / first NUM_LABELS cols.
    logits_ref[...] = jnp.broadcast_to(
        logits, (1, OUT_SUBLANES, LOGITS_PAD)).astype(logits_ref.dtype)


# ---------------- parameter init (deterministic, synthetic) ----------------
def init_params(key):
    keys = iter(jax.random.split(key, 64))

    def nrm(shape):
        return 0.02 * jax.random.normal(next(keys), shape, jnp.float32)

    cls_w = nrm((HIDDEN, NUM_LABELS))
    cls_w_pad = jnp.zeros((HIDDEN, LOGITS_PAD), jnp.float32).at[:, :NUM_LABELS].set(cls_w)

    params = {
        "word_emb": nrm((VOCAB, HIDDEN)),
        "pos_emb": nrm((MAX_POS, HIDDEN)),
        "type_emb": nrm((TYPE_VOCAB, HIDDEN)),
        "emb_ln_g": jnp.ones((1, HIDDEN), jnp.float32),
        "emb_ln_b": jnp.zeros((1, HIDDEN), jnp.float32),
        # bf16 weights at the MXU (halves weight DMA / VMEM); biases stay f32.
        "pool_w": nrm((HIDDEN, HIDDEN)).astype(jnp.bfloat16),
        "pool_b": jnp.zeros((1, HIDDEN), jnp.float32),
        "cls_w_pad": cls_w_pad.astype(jnp.bfloat16),
        "cls_b_pad": jnp.zeros((1, LOGITS_PAD), jnp.float32),
    }

    wqkv, bqkv, wo, bo = [], [], [], []
    ln1_g, ln1_b, w1, b1, w2, b2, ln2_g, ln2_b = ([] for _ in range(8))
    for _ in range(NUM_LAYERS):
        wq, wk, wv = nrm((HIDDEN, HIDDEN)), nrm((HIDDEN, HIDDEN)), nrm((HIDDEN, HIDDEN))
        wqkv.append(jnp.concatenate([wq, wk, wv], axis=1))     # (H, 3H) fused QKV
        bqkv.append(jnp.zeros((1, 3 * HIDDEN), jnp.float32))
        wo.append(nrm((HIDDEN, HIDDEN)))
        bo.append(jnp.zeros((1, HIDDEN), jnp.float32))
        ln1_g.append(jnp.ones((1, HIDDEN), jnp.float32))
        ln1_b.append(jnp.zeros((1, HIDDEN), jnp.float32))
        w1.append(nrm((HIDDEN, INTERMEDIATE)))
        b1.append(jnp.zeros((1, INTERMEDIATE), jnp.float32))
        w2.append(nrm((INTERMEDIATE, HIDDEN)))
        b2.append(jnp.zeros((1, HIDDEN), jnp.float32))
        ln2_g.append(jnp.ones((1, HIDDEN), jnp.float32))
        ln2_b.append(jnp.zeros((1, HIDDEN), jnp.float32))

    params.update(
        wqkv=jnp.stack(wqkv).astype(jnp.bfloat16),
        bqkv=jnp.stack(bqkv),
        wo=jnp.stack(wo).astype(jnp.bfloat16),
        bo=jnp.stack(bo),
        ln1_g=jnp.stack(ln1_g), ln1_b=jnp.stack(ln1_b),
        w1=jnp.stack(w1).astype(jnp.bfloat16), b1=jnp.stack(b1),
        w2=jnp.stack(w2).astype(jnp.bfloat16), b2=jnp.stack(b2),
        ln2_g=jnp.stack(ln2_g), ln2_b=jnp.stack(ln2_b),
    )
    return params


# ---------------- forward pass (gathers in JAX glue, one fused Pallas call) ----------------
def bert_forward(params, input_ids, attention_mask, token_type_ids):
    B, S = input_ids.shape

    # Embedding gathers are glue (plain JAX); everything else is one pallas_call.
    pos_ids = jnp.arange(S, dtype=jnp.int32)
    emb = (jnp.take(params["word_emb"], input_ids, axis=0)
           + params["pos_emb"][pos_ids][None, :, :]
           + jnp.take(params["type_emb"], token_type_ids, axis=0)).astype(jnp.float32)

    # HF-style extended attention mask -> additive bias (B, 1, S), f32.
    mask_bias = ((1.0 - attention_mask.astype(jnp.float32)) * -1e9).reshape(B, 1, S)

    inputs = (
        emb, mask_bias,
        params["emb_ln_g"], params["emb_ln_b"],
        params["wqkv"], params["bqkv"],
        params["wo"], params["bo"],
        params["ln1_g"], params["ln1_b"],
        params["w1"], params["b1"],
        params["w2"], params["b2"],
        params["ln2_g"], params["ln2_b"],
        params["pool_w"], params["pool_b"],
        params["cls_w_pad"], params["cls_b_pad"],
    )

    def _const_index_map(ndim):
        return lambda b: (0,) * ndim

    in_specs = [
        pl.BlockSpec((1, S, HIDDEN), lambda b: (b, 0, 0)),   # per-batch embeddings
        pl.BlockSpec((1, 1, S), lambda b: (b, 0, 0)),        # per-batch mask bias
    ] + [pl.BlockSpec(w.shape, _const_index_map(w.ndim))     # VMEM-resident weights
         for w in inputs[2:]]

    out_specs = pl.BlockSpec((1, OUT_SUBLANES, LOGITS_PAD), lambda b: (b, 0, 0))

    # Advisory cost estimate for XLA scheduling around the fused custom call.
    M = B * S
    flops = NUM_LAYERS * (
        2 * M * HIDDEN * 3 * HIDDEN                        # fused QKV
        + 2 * 2 * B * NUM_HEADS * S * S * HEAD_DIM         # qk^T and p@v
        + 2 * M * HIDDEN * HIDDEN                          # output projection
        + 2 * 2 * M * HIDDEN * INTERMEDIATE                # FFN
    ) + 2 * B * HIDDEN * HIDDEN + 2 * B * HIDDEN * LOGITS_PAD
    transcendentals = (NUM_LAYERS * (NUM_HEADS * B * S * S + M * INTERMEDIATE)
                       + B * HIDDEN)
    bytes_accessed = sum(int(a.size) * a.dtype.itemsize for a in inputs) \
        + B * OUT_SUBLANES * LOGITS_PAD * 4

    padded = pl.pallas_call(
        _bert_fused_kernel,
        grid=(B,),
        in_specs=in_specs,
        out_specs=out_specs,
        out_shape=jax.ShapeDtypeStruct((B, OUT_SUBLANES, LOGITS_PAD), jnp.float32),
        compiler_params=pltpu.CompilerParams(
            dimension_semantics=("parallel",)),              # shards batch across v7x's 2 TCs
        cost_estimate=pl.CostEstimate(flops=flops,
                                      transcendentals=transcendentals,
                                      bytes_accessed=bytes_accessed),
    )(*inputs)

    # Slice the lane-dense padded output back to (B, NUM_LABELS).
    return padded[:, 0, :NUM_LABELS]


if __name__ == "__main__":
    key = jax.random.PRNGKey(0)
    pkey, dkey = jax.random.split(key)
    params = init_params(pkey)

    B, S = 2, 8
    input_ids = jax.random.randint(dkey, (B, S), 0, VOCAB, dtype=jnp.int32)
    attention_mask = jnp.ones((B, S), dtype=jnp.int32).at[1, 6:].set(0)
    token_type_ids = jnp.zeros((B, S), dtype=jnp.int32)

    fwd = jax.jit(bert_forward)
    logits = fwd(params, input_ids, attention_mask, token_type_ids)
    logits = jax.block_until_ready(logits)
    assert logits.shape == (B, NUM_LABELS)
    assert bool(jnp.all(jnp.isfinite(logits)))
    print("KERNEL_OK")
</pallas_src>

<mosaic_0001>
module attributes {stable_mosaic.version = 11 : i64} {
  func.func @_bert_fused_kernel(%arg0: i32, %arg1: memref<1x8x32xf32, #tpu.memory_space<vmem>>, %arg2: memref<1x1x8xf32, #tpu.memory_space<vmem>>, %arg3: memref<1x32xf32, #tpu.memory_space<vmem>>, %arg4: memref<1x32xf32, #tpu.memory_space<vmem>>, %arg5: memref<2x32x96xbf16, #tpu.memory_space<vmem>>, %arg6: memref<2x1x96xf32, #tpu.memory_space<vmem>>, %arg7: memref<2x32x32xbf16, #tpu.memory_space<vmem>>, %arg8: memref<2x1x32xf32, #tpu.memory_space<vmem>>, %arg9: memref<2x1x32xf32, #tpu.memory_space<vmem>>, %arg10: memref<2x1x32xf32, #tpu.memory_space<vmem>>, %arg11: memref<2x32x64xbf16, #tpu.memory_space<vmem>>, %arg12: memref<2x1x64xf32, #tpu.memory_space<vmem>>, %arg13: memref<2x64x32xbf16, #tpu.memory_space<vmem>>, %arg14: memref<2x1x32xf32, #tpu.memory_space<vmem>>, %arg15: memref<2x1x32xf32, #tpu.memory_space<vmem>>, %arg16: memref<2x1x32xf32, #tpu.memory_space<vmem>>, %arg17: memref<32x32xbf16, #tpu.memory_space<vmem>>, %arg18: memref<1x32xf32, #tpu.memory_space<vmem>>, %arg19: memref<32x128xbf16, #tpu.memory_space<vmem>>, %arg20: memref<1x128xf32, #tpu.memory_space<vmem>>, %arg21: memref<1x8x128xf32, #tpu.memory_space<vmem>>) attributes {dimension_semantics = [#tpu.dimension_semantics<parallel>], iteration_bounds = array<i64: 2>, scalar_prefetch = 0 : i64, scratch_operands = 0 : i64, tpu.core_type = #tpu.core_type<tc>, window_params = [{transform_indices = @transform_0, window_bounds = array<i64: 1, 8, 32>}, {transform_indices = @transform_1, window_bounds = array<i64: 1, 1, 8>}, {pipeline_mode = #tpu.pipeline_mode<synchronous>, transform_indices = @transform_2, window_bounds = array<i64: 1, 32>}, {pipeline_mode = #tpu.pipeline_mode<synchronous>, transform_indices = @transform_3, window_bounds = array<i64: 1, 32>}, {pipeline_mode = #tpu.pipeline_mode<synchronous>, transform_indices = @transform_4, window_bounds = array<i64: 2, 32, 96>}, {pipeline_mode = #tpu.pipeline_mode<synchronous>, transform_indices = @transform_5, window_bounds = array<i64: 2, 1, 96>}, {pipeline_mode = #tpu.pipeline_mode<synchronous>, transform_indices = @transform_6, window_bounds = array<i64: 2, 32, 32>}, {pipeline_mode = #tpu.pipeline_mode<synchronous>, transform_indices = @transform_7, window_bounds = array<i64: 2, 1, 32>}, {pipeline_mode = #tpu.pipeline_mode<synchronous>, transform_indices = @transform_8, window_bounds = array<i64: 2, 1, 32>}, {pipeline_mode = #tpu.pipeline_mode<synchronous>, transform_indices = @transform_9, window_bounds = array<i64: 2, 1, 32>}, {pipeline_mode = #tpu.pipeline_mode<synchronous>, transform_indices = @transform_10, window_bounds = array<i64: 2, 32, 64>}, {pipeline_mode = #tpu.pipeline_mode<synchronous>, transform_indices = @transform_11, window_bounds = array<i64: 2, 1, 64>}, {pipeline_mode = #tpu.pipeline_mode<synchronous>, transform_indices = @transform_12, window_bounds = array<i64: 2, 64, 32>}, {pipeline_mode = #tpu.pipeline_mode<synchronous>, transform_indices = @transform_13, window_bounds = array<i64: 2, 1, 32>}, {pipeline_mode = #tpu.pipeline_mode<synchronous>, transform_indices = @transform_14, window_bounds = array<i64: 2, 1, 32>}, {pipeline_mode = #tpu.pipeline_mode<synchronous>, transform_indices = @transform_15, window_bounds = array<i64: 2, 1, 32>}, {pipeline_mode = #tpu.pipeline_mode<synchronous>, transform_indices = @transform_16, window_bounds = array<i64: 32, 32>}, {pipeline_mode = #tpu.pipeline_mode<synchronous>, transform_indices = @transform_17, window_bounds = array<i64: 1, 32>}, {pipeline_mode = #tpu.pipeline_mode<synchronous>, transform_indices = @transform_18, window_bounds = array<i64: 32, 128>}, {pipeline_mode = #tpu.pipeline_mode<synchronous>, transform_indices = @transform_19, window_bounds = array<i64: 1, 128>}, {transform_indices = @transform_20, window_bounds = array<i64: 1, 8, 128>}]} {
    %c0 = arith.constant 0 : index
    %c0_0 = arith.constant 0 : index
    %c0_1 = arith.constant 0 : index
    %0 = vector.load %arg2[%c0, %c0_0, %c0_1] : memref<1x1x8xf32, #tpu.memory_space<vmem>>, vector<1x1x8xf32>
    %1 = vector.shape_cast %0 : vector<1x1x8xf32> to vector<1x8xf32>
    %c0_2 = arith.constant 0 : index
    %c0_3 = arith.constant 0 : index
    %c0_4 = arith.constant 0 : index
    %2 = vector.load %arg1[%c0_2, %c0_3, %c0_4] : memref<1x8x32xf32, #tpu.memory_space<vmem>>, vector<1x8x32xf32>
    %3 = vector.shape_cast %2 : vector<1x8x32xf32> to vector<8x32xf32>
    %c0_5 = arith.constant 0 : index
    %c0_6 = arith.constant 0 : index
    %4 = vector.load %arg3[%c0_5, %c0_6] : memref<1x32xf32, #tpu.memory_space<vmem>>, vector<1x32xf32>
    %c0_7 = arith.constant 0 : index
    %c0_8 = arith.constant 0 : index
    %5 = vector.load %arg4[%c0_7, %c0_8] : memref<1x32xf32, #tpu.memory_space<vmem>>, vector<1x32xf32>
    %cst = arith.constant dense<0.000000e+00> : vector<8xf32>
    %6 = vector.multi_reduction <add>, %3, %cst [1] : vector<8x32xf32> to vector<8xf32>
    %7 = vector.shape_cast %6 : vector<8xf32> to vector<8x1xf32>
    %cst_9 = arith.constant 3.200000e+01 : f32
    %8 = vector.broadcast %cst_9 : f32 to vector<8x1xf32>
    %9 = arith.divf %7, %8 : vector<8x1xf32>
    %10 = vector.broadcast %9 : vector<8x1xf32> to vector<8x32xf32>
    %11 = arith.subf %3, %10 : vector<8x32xf32>
    %12 = vector.broadcast %9 : vector<8x1xf32> to vector<8x32xf32>
    %13 = arith.subf %3, %12 : vector<8x32xf32>
    %14 = arith.mulf %11, %13 : vector<8x32xf32>
    %cst_10 = arith.constant dense<0.000000e+00> : vector<8xf32>
    %15 = vector.multi_reduction <add>, %14, %cst_10 [1] : vector<8x32xf32> to vector<8xf32>
    %16 = vector.shape_cast %15 : vector<8xf32> to vector<8x1xf32>
    %cst_11 = arith.constant 3.200000e+01 : f32
    %17 = vector.broadcast %cst_11 : f32 to vector<8x1xf32>
    %18 = arith.divf %16, %17 : vector<8x1xf32>
    %19 = vector.broadcast %9 : vector<8x1xf32> to vector<8x32xf32>
    %20 = arith.subf %3, %19 : vector<8x32xf32>
    %cst_12 = arith.constant 9.99999996E-13 : f32
    %21 = vector.broadcast %cst_12 : f32 to vector<8x1xf32>
    %22 = arith.addf %18, %21 : vector<8x1xf32>
    %23 = math.rsqrt %22 : vector<8x1xf32>
    %24 = vector.broadcast %23 : vector<8x1xf32> to vector<8x32xf32>
    %25 = arith.mulf %20, %24 : vector<8x32xf32>
    %26 = vector.broadcast %4 : vector<1x32xf32> to vector<8x32xf32>
    %27 = arith.mulf %25, %26 : vector<8x32xf32>
    %28 = vector.broadcast %5 : vector<1x32xf32> to vector<8x32xf32>
    %29 = arith.addf %27, %28 : vector<8x32xf32>
    %30 = arith.truncf %29 : vector<8x32xf32> to vector<8x32xbf16>
    %c0_13 = arith.constant 0 : index
    %c0_14 = arith.constant 0 : index
    %c0_15 = arith.constant 0 : index
    %31 = vector.load %arg5[%c0_13, %c0_14, %c0_15] : memref<2x32x96xbf16, #tpu.memory_space<vmem>>, vector<1x32x96xbf16>
    %32 = vector.shape_cast %31 : vector<1x32x96xbf16> to vector<32x96xbf16>
    %cst_16 = arith.constant dense<0.000000e+00> : vector<8x96xf32>
    %33 = tpu.matmul %30, %32, %cst_16 {dimension_numbers = #tpu.dot_dimension_numbers<[1], [0], [0], [1], [0, 0, 1, 1], [], []>} : vector<8x32xbf16>, vector<32x96xbf16>, vector<8x96xf32> -> vector<8x96xf32>
    %c0_17 = arith.constant 0 : index
    %c0_18 = arith.constant 0 : index
    %c0_19 = arith.constant 0 : index
    %34 = vector.load %arg6[%c0_17, %c0_18, %c0_19] : memref<2x1x96xf32, #tpu.memory_space<vmem>>, vector<1x1x96xf32>
    %35 = vector.shape_cast %34 : vector<1x1x96xf32> to vector<1x96xf32>
    %36 = vector.broadcast %35 : vector<1x96xf32> to vector<8x96xf32>
    %37 = arith.addf %33, %36 : vector<8x96xf32>
    %38 = vector.extract_strided_slice %37 {offsets = [0, 0], sizes = [8, 32], strides = [1, 1]} : vector<8x96xf32> to vector<8x32xf32>
    %39 = vector.extract_strided_slice %37 {offsets = [0, 32], sizes = [8, 32], strides = [1, 1]} : vector<8x96xf32> to vector<8x32xf32>
    %40 = vector.extract_strided_slice %37 {offsets = [0, 64], sizes = [8, 32], strides = [1, 1]} : vector<8x96xf32> to vector<8x32xf32>
    %41 = vector.extract_strided_slice %38 {offsets = [0, 0], sizes = [8, 8], strides = [1, 1]} : vector<8x32xf32> to vector<8x8xf32>
    %42 = vector.extract_strided_slice %38 {offsets = [0, 8], sizes = [8, 8], strides = [1, 1]} : vector<8x32xf32> to vector<8x8xf32>
    %43 = vector.extract_strided_slice %38 {offsets = [0, 16], sizes = [8, 8], strides = [1, 1]} : vector<8x32xf32> to vector<8x8xf32>
    %44 = vector.extract_strided_slice %38 {offsets = [0, 24], sizes = [8, 8], strides = [1, 1]} : vector<8x32xf32> to vector<8x8xf32>
    %45 = vector.shape_cast %41 : vector<8x8xf32> to vector<1x8x8xf32>
    %46 = vector.shape_cast %42 : vector<8x8xf32> to vector<1x8x8xf32>
    %47 = vector.shape_cast %43 : vector<8x8xf32> to vector<1x8x8xf32>
    %48 = vector.shape_cast %44 : vector<8x8xf32> to vector<1x8x8xf32>
    %49 = tpu.concatenate %45, %46, %47, %48 in 0 : vector<1x8x8xf32>, vector<1x8x8xf32>, vector<1x8x8xf32>, vector<1x8x8xf32> -> vector<4x8x8xf32>
    %50 = vector.extract_strided_slice %39 {offsets = [0, 0], sizes = [8, 8], strides = [1, 1]} : vector<8x32xf32> to vector<8x8xf32>
    %51 = vector.extract_strided_slice %39 {offsets = [0, 8], sizes = [8, 8], strides = [1, 1]} : vector<8x32xf32> to vector<8x8xf32>
    %52 = vector.extract_strided_slice %39 {offsets = [0, 16], sizes = [8, 8], strides = [1, 1]} : vector<8x32xf32> to vector<8x8xf32>
    %53 = vector.extract_strided_slice %39 {offsets = [0, 24], sizes = [8, 8], strides = [1, 1]} : vector<8x32xf32> to vector<8x8xf32>
    %54 = vector.shape_cast %50 : vector<8x8xf32> to vector<1x8x8xf32>
    %55 = vector.shape_cast %51 : vector<8x8xf32> to vector<1x8x8xf32>
    %56 = vector.shape_cast %52 : vector<8x8xf32> to vector<1x8x8xf32>
    %57 = vector.shape_cast %53 : vector<8x8xf32> to vector<1x8x8xf32>
    %58 = tpu.concatenate %54, %55, %56, %57 in 0 : vector<1x8x8xf32>, vector<1x8x8xf32>, vector<1x8x8xf32>, vector<1x8x8xf32> -> vector<4x8x8xf32>
    %59 = vector.extract_strided_slice %40 {offsets = [0, 0], sizes = [8, 8], strides = [1, 1]} : vector<8x32xf32> to vector<8x8xf32>
    %60 = vector.extract_strided_slice %40 {offsets = [0, 8], sizes = [8, 8], strides = [1, 1]} : vector<8x32xf32> to vector<8x8xf32>
    %61 = vector.extract_strided_slice %40 {offsets = [0, 16], sizes = [8, 8], strides = [1, 1]} : vector<8x32xf32> to vector<8x8xf32>
    %62 = vector.extract_strided_slice %40 {offsets = [0, 24], sizes = [8, 8], strides = [1, 1]} : vector<8x32xf32> to vector<8x8xf32>
    %63 = vector.shape_cast %59 : vector<8x8xf32> to vector<1x8x8xf32>
    %64 = vector.shape_cast %60 : vector<8x8xf32> to vector<1x8x8xf32>
    %65 = vector.shape_cast %61 : vector<8x8xf32> to vector<1x8x8xf32>
    %66 = vector.shape_cast %62 : vector<8x8xf32> to vector<1x8x8xf32>
    %67 = tpu.concatenate %63, %64, %65, %66 in 0 : vector<1x8x8xf32>, vector<1x8x8xf32>, vector<1x8x8xf32>, vector<1x8x8xf32> -> vector<4x8x8xf32>
    %68 = arith.truncf %49 : vector<4x8x8xf32> to vector<4x8x8xbf16>
    %69 = arith.truncf %58 : vector<4x8x8xf32> to vector<4x8x8xbf16>
    "tpu.trace_start"() <{level = 10 : i32, message = "nqd,nkd->nqk"}> : () -> ()
    %cst_20 = arith.constant dense<0.000000e+00> : vector<4x8x8xf32>
    %70 = tpu.matmul %68, %69, %cst_20 {dimension_numbers = #tpu.dot_dimension_numbers<[2], [2], [1], [1], [0, 0, 0, 1, 1, 1], [0], [0]>} : vector<4x8x8xbf16>, vector<4x8x8xbf16>, vector<4x8x8xf32> -> vector<4x8x8xf32>
    "tpu.trace_stop"() : () -> ()
    %cst_21 = arith.constant 0.353553385 : f32
    %71 = vector.broadcast %cst_21 : f32 to vector<4x8x8xf32>
    %72 = arith.mulf %70, %71 : vector<4x8x8xf32>
    %73 = vector.shape_cast %1 : vector<1x8xf32> to vector<1x1x8xf32>
    %74 = vector.broadcast %73 : vector<1x1x8xf32> to vector<4x8x8xf32>
    %75 = arith.addf %72, %74 : vector<4x8x8xf32>
    %cst_22 = arith.constant dense<0xFF800000> : vector<4x8xf32>
    %76 = vector.multi_reduction <maximumf>, %75, %cst_22 [2] : vector<4x8x8xf32> to vector<4x8xf32>
    %77 = vector.shape_cast %76 : vector<4x8xf32> to vector<4x8x1xf32>
    %78 = vector.broadcast %77 : vector<4x8x1xf32> to vector<4x8x8xf32>
    %79 = arith.subf %75, %78 : vector<4x8x8xf32>
    %80 = math.exp %79 : vector<4x8x8xf32>
    %cst_23 = arith.constant dense<0.000000e+00> : vector<4x8xf32>
    %81 = vector.multi_reduction <add>, %80, %cst_23 [2] : vector<4x8x8xf32> to vector<4x8xf32>
    %82 = vector.shape_cast %81 : vector<4x8xf32> to vector<4x8x1xf32>
    %83 = tpu.reciprocal %82 {approx = true} : vector<4x8x1xf32> -> vector<4x8x1xf32>
    %84 = vector.broadcast %83 : vector<4x8x1xf32> to vector<4x8x8xf32>
    %85 = arith.mulf %80, %84 : vector<4x8x8xf32>
    %86 = arith.truncf %85 : vector<4x8x8xf32> to vector<4x8x8xbf16>
    %87 = arith.truncf %67 : vector<4x8x8xf32> to vector<4x8x8xbf16>
    "tpu.trace_start"() <{level = 10 : i32, message = "nqk,nkd->nqd"}> : () -> ()
    %cst_24 = arith.constant dense<0.000000e+00> : vector<4x8x8xf32>
    %88 = tpu.matmul %86, %87, %cst_24 {dimension_numbers = #tpu.dot_dimension_numbers<[2], [1], [1], [2], [0, 0, 0, 1, 1, 2], [0], [0]>} : vector<4x8x8xbf16>, vector<4x8x8xbf16>, vector<4x8x8xf32> -> vector<4x8x8xf32>
    "tpu.trace_stop"() : () -> ()
    %89 = vector.extract_strided_slice %88 {offsets = [0, 0, 0], sizes = [1, 8, 8], strides = [1, 1, 1]} : vector<4x8x8xf32> to vector<1x8x8xf32>
    %90 = vector.shape_cast %89 : vector<1x8x8xf32> to vector<8x8xf32>
    %91 = vector.extract_strided_slice %88 {offsets = [1, 0, 0], sizes = [1, 8, 8], strides = [1, 1, 1]} : vector<4x8x8xf32> to vector<1x8x8xf32>
    %92 = vector.shape_cast %91 : vector<1x8x8xf32> to vector<8x8xf32>
    %93 = vector.extract_strided_slice %88 {offsets = [2, 0, 0], sizes = [1, 8, 8], strides = [1, 1, 1]} : vector<4x8x8xf32> to vector<1x8x8xf32>
    %94 = vector.shape_cast %93 : vector<1x8x8xf32> to vector<8x8xf32>
    %95 = vector.extract_strided_slice %88 {offsets = [3, 0, 0], sizes = [1, 8, 8], strides = [1, 1, 1]} : vector<4x8x8xf32> to vector<1x8x8xf32>
    %96 = vector.shape_cast %95 : vector<1x8x8xf32> to vector<8x8xf32>
    %97 = tpu.concatenate %90, %92, %94, %96 in 1 : vector<8x8xf32>, vector<8x8xf32>, vector<8x8xf32>, vector<8x8xf32> -> vector<8x32xf32>
    %98 = arith.truncf %97 : vector<8x32xf32> to vector<8x32xbf16>
    %c0_25 = arith.constant 0 : index
    %c0_26 = arith.constant 0 : index
    %c0_27 = arith.constant 0 : index
    %99 = vector.load %arg7[%c0_25, %c0_26, %c0_27] : memref<2x32x32xbf16, #tpu.memory_space<vmem>>, vector<1x32x32xbf16>
    %100 = vector.shape_cast %99 : vector<1x32x32xbf16> to vector<32x32xbf16>
    %cst_28 = arith.constant dense<0.000000e+00> : vector<8x32xf32>
    %101 = tpu.matmul %98, %100, %cst_28 {dimension_numbers = #tpu.dot_dimension_numbers<[1], [0], [0], [1], [0, 0, 1, 1], [], []>} : vector<8x32xbf16>, vector<32x32xbf16>, vector<8x32xf32> -> vector<8x32xf32>
    %c0_29 = arith.constant 0 : index
    %c0_30 = arith.constant 0 : index
    %c0_31 = arith.constant 0 : index
    %102 = vector.load %arg8[%c0_29, %c0_30, %c0_31] : memref<2x1x32xf32, #tpu.memory_space<vmem>>, vector<1x1x32xf32>
    %103 = vector.shape_cast %102 : vector<1x1x32xf32> to vector<1x32xf32>
    %104 = vector.broadcast %103 : vector<1x32xf32> to vector<8x32xf32>
    %105 = arith.addf %101, %104 : vector<8x32xf32>
    %106 = arith.addf %29, %105 : vector<8x32xf32>
    %c0_32 = arith.constant 0 : index
    %c0_33 = arith.constant 0 : index
    %c0_34 = arith.constant 0 : index
    %107 = vector.load %arg9[%c0_32, %c0_33, %c0_34] : memref<2x1x32xf32, #tpu.memory_space<vmem>>, vector<1x1x32xf32>
    %108 = vector.shape_cast %107 : vector<1x1x32xf32> to vector<1x32xf32>
    %c0_35 = arith.constant 0 : index
    %c0_36 = arith.constant 0 : index
    %c0_37 = arith.constant 0 : index
    %109 = vector.load %arg10[%c0_35, %c0_36, %c0_37] : memref<2x1x32xf32, #tpu.memory_space<vmem>>, vector<1x1x32xf32>
    %110 = vector.shape_cast %109 : vector<1x1x32xf32> to vector<1x32xf32>
    %cst_38 = arith.constant dense<0.000000e+00> : vector<8xf32>
    %111 = vector.multi_reduction <add>, %106, %cst_38 [1] : vector<8x32xf32> to vector<8xf32>
    %112 = vector.shape_cast %111 : vector<8xf32> to vector<8x1xf32>
    %cst_39 = arith.constant 3.200000e+01 : f32
    %113 = vector.broadcast %cst_39 : f32 to vector<8x1xf32>
    %114 = arith.divf %112, %113 : vector<8x1xf32>
    %115 = vector.broadcast %114 : vector<8x1xf32> to vector<8x32xf32>
    %116 = arith.subf %106, %115 : vector<8x32xf32>
    %117 = vector.broadcast %114 : vector<8x1xf32> to vector<8x32xf32>
    %118 = arith.subf %106, %117 : vector<8x32xf32>
    %119 = arith.mulf %116, %118 : vector<8x32xf32>
    %cst_40 = arith.constant dense<0.000000e+00> : vector<8xf32>
    %120 = vector.multi_reduction <add>, %119, %cst_40 [1] : vector<8x32xf32> to vector<8xf32>
    %121 = vector.shape_cast %120 : vector<8xf32> to vector<8x1xf32>
    %cst_41 = arith.constant 3.200000e+01 : f32
    %122 = vector.broadcast %cst_41 : f32 to vector<8x1xf32>
    %123 = arith.divf %121, %122 : vector<8x1xf32>
    %124 = vector.broadcast %114 : vector<8x1xf32> to vector<8x32xf32>
    %125 = arith.subf %106, %124 : vector<8x32xf32>
    %cst_42 = arith.constant 9.99999996E-13 : f32
    %126 = vector.broadcast %cst_42 : f32 to vector<8x1xf32>
    %127 = arith.addf %123, %126 : vector<8x1xf32>
    %128 = math.rsqrt %127 : vector<8x1xf32>
    %129 = vector.broadcast %128 : vector<8x1xf32> to vector<8x32xf32>
    %130 = arith.mulf %125, %129 : vector<8x32xf32>
    %131 = vector.broadcast %108 : vector<1x32xf32> to vector<8x32xf32>
    %132 = arith.mulf %130, %131 : vector<8x32xf32>
    %133 = vector.broadcast %110 : vector<1x32xf32> to vector<8x32xf32>
    %134 = arith.addf %132, %133 : vector<8x32xf32>
    %135 = arith.truncf %134 : vector<8x32xf32> to vector<8x32xbf16>
    %c0_43 = arith.constant 0 : index
    %c0_44 = arith.constant 0 : index
    %c0_45 = arith.constant 0 : index
    %136 = vector.load %arg11[%c0_43, %c0_44, %c0_45] : memref<2x32x64xbf16, #tpu.memory_space<vmem>>, vector<1x32x64xbf16>
    %137 = vector.shape_cast %136 : vector<1x32x64xbf16> to vector<32x64xbf16>
    %cst_46 = arith.constant dense<0.000000e+00> : vector<8x64xf32>
    %138 = tpu.matmul %135, %137, %cst_46 {dimension_numbers = #tpu.dot_dimension_numbers<[1], [0], [0], [1], [0, 0, 1, 1], [], []>} : vector<8x32xbf16>, vector<32x64xbf16>, vector<8x64xf32> -> vector<8x64xf32>
    %c0_47 = arith.constant 0 : index
    %c0_48 = arith.constant 0 : index
    %c0_49 = arith.constant 0 : index
    %139 = vector.load %arg12[%c0_47, %c0_48, %c0_49] : memref<2x1x64xf32, #tpu.memory_space<vmem>>, vector<1x1x64xf32>
    %140 = vector.shape_cast %139 : vector<1x1x64xf32> to vector<1x64xf32>
    %141 = vector.broadcast %140 : vector<1x64xf32> to vector<8x64xf32>
    %142 = arith.addf %138, %141 : vector<8x64xf32>
    %cst_50 = arith.constant 5.000000e-01 : f32
    %143 = vector.broadcast %cst_50 : f32 to vector<8x64xf32>
    %144 = arith.mulf %143, %142 : vector<8x64xf32>
    %cst_51 = arith.constant 4.471500e-02 : f32
    %145 = vector.broadcast %cst_51 : f32 to vector<8x64xf32>
    %146 = arith.mulf %145, %142 : vector<8x64xf32>
    %147 = arith.mulf %146, %142 : vector<8x64xf32>
    %148 = arith.mulf %147, %142 : vector<8x64xf32>
    %149 = arith.addf %142, %148 : vector<8x64xf32>
    %cst_52 = arith.constant 0.797884583 : f32
    %150 = vector.broadcast %cst_52 : f32 to vector<8x64xf32>
    %151 = arith.mulf %150, %149 : vector<8x64xf32>
    %152 = math.tanh %151 : vector<8x64xf32>
    %cst_53 = arith.constant 1.000000e+00 : f32
    %153 = vector.broadcast %cst_53 : f32 to vector<8x64xf32>
    %154 = arith.addf %153, %152 : vector<8x64xf32>
    %155 = arith.mulf %144, %154 : vector<8x64xf32>
    %156 = arith.truncf %155 : vector<8x64xf32> to vector<8x64xbf16>
    %c0_54 = arith.constant 0 : index
    %c0_55 = arith.constant 0 : index
    %c0_56 = arith.constant 0 : index
    %157 = vector.load %arg13[%c0_54, %c0_55, %c0_56] : memref<2x64x32xbf16, #tpu.memory_space<vmem>>, vector<1x64x32xbf16>
    %158 = vector.shape_cast %157 : vector<1x64x32xbf16> to vector<64x32xbf16>
    %cst_57 = arith.constant dense<0.000000e+00> : vector<8x32xf32>
    %159 = tpu.matmul %156, %158, %cst_57 {dimension_numbers = #tpu.dot_dimension_numbers<[1], [0], [0], [1], [0, 0, 1, 1], [], []>} : vector<8x64xbf16>, vector<64x32xbf16>, vector<8x32xf32> -> vector<8x32xf32>
    %c0_58 = arith.constant 0 : index
    %c0_59 = arith.constant 0 : index
    %c0_60 = arith.constant 0 : index
    %160 = vector.load %arg14[%c0_58, %c0_59, %c0_60] : memref<2x1x32xf32, #tpu.memory_space<vmem>>, vector<1x1x32xf32>
    %161 = vector.shape_cast %160 : vector<1x1x32xf32> to vector<1x32xf32>
    %162 = vector.broadcast %161 : vector<1x32xf32> to vector<8x32xf32>
    %163 = arith.addf %159, %162 : vector<8x32xf32>
    %164 = arith.addf %134, %163 : vector<8x32xf32>
    %c0_61 = arith.constant 0 : index
    %c0_62 = arith.constant 0 : index
    %c0_63 = arith.constant 0 : index
    %165 = vector.load %arg15[%c0_61, %c0_62, %c0_63] : memref<2x1x32xf32, #tpu.memory_space<vmem>>, vector<1x1x32xf32>
    %166 = vector.shape_cast %165 : vector<1x1x32xf32> to vector<1x32xf32>
    %c0_64 = arith.constant 0 : index
    %c0_65 = arith.constant 0 : index
    %c0_66 = arith.constant 0 : index
    %167 = vector.load %arg16[%c0_64, %c0_65, %c0_66] : memref<2x1x32xf32, #tpu.memory_space<vmem>>, vector<1x1x32xf32>
    %168 = vector.shape_cast %167 : vector<1x1x32xf32> to vector<1x32xf32>
    %cst_67 = arith.constant dense<0.000000e+00> : vector<8xf32>
    %169 = vector.multi_reduction <add>, %164, %cst_67 [1] : vector<8x32xf32> to vector<8xf32>
    %170 = vector.shape_cast %169 : vector<8xf32> to vector<8x1xf32>
    %cst_68 = arith.constant 3.200000e+01 : f32
    %171 = vector.broadcast %cst_68 : f32 to vector<8x1xf32>
    %172 = arith.divf %170, %171 : vector<8x1xf32>
    %173 = vector.broadcast %172 : vector<8x1xf32> to vector<8x32xf32>
    %174 = arith.subf %164, %173 : vector<8x32xf32>
    %175 = vector.broadcast %172 : vector<8x1xf32> to vector<8x32xf32>
    %176 = arith.subf %164, %175 : vector<8x32xf32>
    %177 = arith.mulf %174, %176 : vector<8x32xf32>
    %cst_69 = arith.constant dense<0.000000e+00> : vector<8xf32>
    %178 = vector.multi_reduction <add>, %177, %cst_69 [1] : vector<8x32xf32> to vector<8xf32>
    %179 = vector.shape_cast %178 : vector<8xf32> to vector<8x1xf32>
    %cst_70 = arith.constant 3.200000e+01 : f32
    %180 = vector.broadcast %cst_70 : f32 to vector<8x1xf32>
    %181 = arith.divf %179, %180 : vector<8x1xf32>
    %182 = vector.broadcast %172 : vector<8x1xf32> to vector<8x32xf32>
    %183 = arith.subf %164, %182 : vector<8x32xf32>
    %cst_71 = arith.constant 9.99999996E-13 : f32
    %184 = vector.broadcast %cst_71 : f32 to vector<8x1xf32>
    %185 = arith.addf %181, %184 : vector<8x1xf32>
    %186 = math.rsqrt %185 : vector<8x1xf32>
    %187 = vector.broadcast %186 : vector<8x1xf32> to vector<8x32xf32>
    %188 = arith.mulf %183, %187 : vector<8x32xf32>
    %189 = vector.broadcast %166 : vector<1x32xf32> to vector<8x32xf32>
    %190 = arith.mulf %188, %189 : vector<8x32xf32>
    %191 = vector.broadcast %168 : vector<1x32xf32> to vector<8x32xf32>
    %192 = arith.addf %190, %191 : vector<8x32xf32>
    %193 = arith.truncf %192 : vector<8x32xf32> to vector<8x32xbf16>
    %c1 = arith.constant 1 : index
    %c0_72 = arith.constant 0 : index
    %c0_73 = arith.constant 0 : index
    %194 = vector.load %arg5[%c1, %c0_72, %c0_73] : memref<2x32x96xbf16, #tpu.memory_space<vmem>>, vector<1x32x96xbf16>
    %195 = vector.shape_cast %194 : vector<1x32x96xbf16> to vector<32x96xbf16>
    %cst_74 = arith.constant dense<0.000000e+00> : vector<8x96xf32>
    %196 = tpu.matmul %193, %195, %cst_74 {dimension_numbers = #tpu.dot_dimension_numbers<[1], [0], [0], [1], [0, 0, 1, 1], [], []>} : vector<8x32xbf16>, vector<32x96xbf16>, vector<8x96xf32> -> vector<8x96xf32>
    %c1_75 = arith.constant 1 : index
    %c0_76 = arith.constant 0 : index
    %c0_77 = arith.constant 0 : index
    %197 = vector.load %arg6[%c1_75, %c0_76, %c0_77] : memref<2x1x96xf32, #tpu.memory_space<vmem>>, vector<1x1x96xf32>
    %198 = vector.shape_cast %197 : vector<1x1x96xf32> to vector<1x96xf32>
    %199 = vector.broadcast %198 : vector<1x96xf32> to vector<8x96xf32>
    %200 = arith.addf %196, %199 : vector<8x96xf32>
    %201 = vector.extract_strided_slice %200 {offsets = [0, 0], sizes = [8, 32], strides = [1, 1]} : vector<8x96xf32> to vector<8x32xf32>
    %202 = vector.extract_strided_slice %200 {offsets = [0, 32], sizes = [8, 32], strides = [1, 1]} : vector<8x96xf32> to vector<8x32xf32>
    %203 = vector.extract_strided_slice %200 {offsets = [0, 64], sizes = [8, 32], strides = [1, 1]} : vector<8x96xf32> to vector<8x32xf32>
    %204 = vector.extract_strided_slice %201 {offsets = [0, 0], sizes = [8, 8], strides = [1, 1]} : vector<8x32xf32> to vector<8x8xf32>
    %205 = vector.extract_strided_slice %201 {offsets = [0, 8], sizes = [8, 8], strides = [1, 1]} : vector<8x32xf32> to vector<8x8xf32>
    %206 = vector.extract_strided_slice %201 {offsets = [0, 16], sizes = [8, 8], strides = [1, 1]} : vector<8x32xf32> to vector<8x8xf32>
    %207 = vector.extract_strided_slice %201 {offsets = [0, 24], sizes = [8, 8], strides = [1, 1]} : vector<8x32xf32> to vector<8x8xf32>
    %208 = vector.shape_cast %204 : vector<8x8xf32> to vector<1x8x8xf32>
    %209 = vector.shape_cast %205 : vector<8x8xf32> to vector<1x8x8xf32>
    %210 = vector.shape_cast %206 : vector<8x8xf32> to vector<1x8x8xf32>
    %211 = vector.shape_cast %207 : vector<8x8xf32> to vector<1x8x8xf32>
    %212 = tpu.concatenate %208, %209, %210, %211 in 0 : vector<1x8x8xf32>, vector<1x8x8xf32>, vector<1x8x8xf32>, vector<1x8x8xf32> -> vector<4x8x8xf32>
    %213 = vector.extract_strided_slice %202 {offsets = [0, 0], sizes = [8, 8], strides = [1, 1]} : vector<8x32xf32> to vector<8x8xf32>
    %214 = vector.extract_strided_slice %202 {offsets = [0, 8], sizes = [8, 8], strides = [1, 1]} : vector<8x32xf32> to vector<8x8xf32>
    %215 = vector.extract_strided_slice %202 {offsets = [0, 16], sizes = [8, 8], strides = [1, 1]} : vector<8x32xf32> to vector<8x8xf32>
    %216 = vector.extract_strided_slice %202 {offsets = [0, 24], sizes = [8, 8], strides = [1, 1]} : vector<8x32xf32> to vector<8x8xf32>
    %217 = vector.shape_cast %213 : vector<8x8xf32> to vector<1x8x8xf32>
    %218 = vector.shape_cast %214 : vector<8x8xf32> to vector<1x8x8xf32>
    %219 = vector.shape_cast %215 : vector<8x8xf32> to vector<1x8x8xf32>
    %220 = vector.shape_cast %216 : vector<8x8xf32> to vector<1x8x8xf32>
    %221 = tpu.concatenate %217, %218, %219, %220 in 0 : vector<1x8x8xf32>, vector<1x8x8xf32>, vector<1x8x8xf32>, vector<1x8x8xf32> -> vector<4x8x8xf32>
    %222 = vector.extract_strided_slice %203 {offsets = [0, 0], sizes = [8, 8], strides = [1, 1]} : vector<8x32xf32> to vector<8x8xf32>
    %223 = vector.extract_strided_slice %203 {offsets = [0, 8], sizes = [8, 8], strides = [1, 1]} : vector<8x32xf32> to vector<8x8xf32>
    %224 = vector.extract_strided_slice %203 {offsets = [0, 16], sizes = [8, 8], strides = [1, 1]} : vector<8x32xf32> to vector<8x8xf32>
    %225 = vector.extract_strided_slice %203 {offsets = [0, 24], sizes = [8, 8], strides = [1, 1]} : vector<8x32xf32> to vector<8x8xf32>
    %226 = vector.shape_cast %222 : vector<8x8xf32> to vector<1x8x8xf32>
    %227 = vector.shape_cast %223 : vector<8x8xf32> to vector<1x8x8xf32>
    %228 = vector.shape_cast %224 : vector<8x8xf32> to vector<1x8x8xf32>
    %229 = vector.shape_cast %225 : vector<8x8xf32> to vector<1x8x8xf32>
    %230 = tpu.concatenate %226, %227, %228, %229 in 0 : vector<1x8x8xf32>, vector<1x8x8xf32>, vector<1x8x8xf32>, vector<1x8x8xf32> -> vector<4x8x8xf32>
    %231 = arith.truncf %212 : vector<4x8x8xf32> to vector<4x8x8xbf16>
    %232 = arith.truncf %221 : vector<4x8x8xf32> to vector<4x8x8xbf16>
    "tpu.trace_start"() <{level = 10 : i32, message = "nqd,nkd->nqk"}> : () -> ()
    %cst_78 = arith.constant dense<0.000000e+00> : vector<4x8x8xf32>
    %233 = tpu.matmul %231, %232, %cst_78 {dimension_numbers = #tpu.dot_dimension_numbers<[2], [2], [1], [1], [0, 0, 0, 1, 1, 1], [0], [0]>} : vector<4x8x8xbf16>, vector<4x8x8xbf16>, vector<4x8x8xf32> -> vector<4x8x8xf32>
    "tpu.trace_stop"() : () -> ()
    %cst_79 = arith.constant 0.353553385 : f32
    %234 = vector.broadcast %cst_79 : f32 to vector<4x8x8xf32>
    %235 = arith.mulf %233, %234 : vector<4x8x8xf32>
    %236 = vector.shape_cast %1 : vector<1x8xf32> to vector<1x1x8xf32>
    %237 = vector.broadcast %236 : vector<1x1x8xf32> to vector<4x8x8xf32>
    %238 = arith.addf %235, %237 : vector<4x8x8xf32>
    %cst_80 = arith.constant dense<0xFF800000> : vector<4x8xf32>
    %239 = vector.multi_reduction <maximumf>, %238, %cst_80 [2] : vector<4x8x8xf32> to vector<4x8xf32>
    %240 = vector.shape_cast %239 : vector<4x8xf32> to vector<4x8x1xf32>
    %241 = vector.broadcast %240 : vector<4x8x1xf32> to vector<4x8x8xf32>
    %242 = arith.subf %238, %241 : vector<4x8x8xf32>
    %243 = math.exp %242 : vector<4x8x8xf32>
    %cst_81 = arith.constant dense<0.000000e+00> : vector<4x8xf32>
    %244 = vector.multi_reduction <add>, %243, %cst_81 [2] : vector<4x8x8xf32> to vector<4x8xf32>
    %245 = vector.shape_cast %244 : vector<4x8xf32> to vector<4x8x1xf32>
    %246 = tpu.reciprocal %245 {approx = true} : vector<4x8x1xf32> -> vector<4x8x1xf32>
    %247 = vector.broadcast %246 : vector<4x8x1xf32> to vector<4x8x8xf32>
    %248 = arith.mulf %243, %247 : vector<4x8x8xf32>
    %249 = arith.truncf %248 : vector<4x8x8xf32> to vector<4x8x8xbf16>
    %250 = arith.truncf %230 : vector<4x8x8xf32> to vector<4x8x8xbf16>
    "tpu.trace_start"() <{level = 10 : i32, message = "nqk,nkd->nqd"}> : () -> ()
    %cst_82 = arith.constant dense<0.000000e+00> : vector<4x8x8xf32>
    %251 = tpu.matmul %249, %250, %cst_82 {dimension_numbers = #tpu.dot_dimension_numbers<[2], [1], [1], [2], [0, 0, 0, 1, 1, 2], [0], [0]>} : vector<4x8x8xbf16>, vector<4x8x8xbf16>, vector<4x8x8xf32> -> vector<4x8x8xf32>
    "tpu.trace_stop"() : () -> ()
    %252 = vector.extract_strided_slice %251 {offsets = [0, 0, 0], sizes = [1, 8, 8], strides = [1, 1, 1]} : vector<4x8x8xf32> to vector<1x8x8xf32>
    %253 = vector.shape_cast %252 : vector<1x8x8xf32> to vector<8x8xf32>
    %254 = vector.extract_strided_slice %251 {offsets = [1, 0, 0], sizes = [1, 8, 8], strides = [1, 1, 1]} : vector<4x8x8xf32> to vector<1x8x8xf32>
    %255 = vector.shape_cast %254 : vector<1x8x8xf32> to vector<8x8xf32>
    %256 = vector.extract_strided_slice %251 {offsets = [2, 0, 0], sizes = [1, 8, 8], strides = [1, 1, 1]} : vector<4x8x8xf32> to vector<1x8x8xf32>
    %257 = vector.shape_cast %256 : vector<1x8x8xf32> to vector<8x8xf32>
    %258 = vector.extract_strided_slice %251 {offsets = [3, 0, 0], sizes = [1, 8, 8], strides = [1, 1, 1]} : vector<4x8x8xf32> to vector<1x8x8xf32>
    %259 = vector.shape_cast %258 : vector<1x8x8xf32> to vector<8x8xf32>
    %260 = tpu.concatenate %253, %255, %257, %259 in 1 : vector<8x8xf32>, vector<8x8xf32>, vector<8x8xf32>, vector<8x8xf32> -> vector<8x32xf32>
    %261 = arith.truncf %260 : vector<8x32xf32> to vector<8x32xbf16>
    %c1_83 = arith.constant 1 : index
    %c0_84 = arith.constant 0 : index
    %c0_85 = arith.constant 0 : index
    %262 = vector.load %arg7[%c1_83, %c0_84, %c0_85] : memref<2x32x32xbf16, #tpu.memory_space<vmem>>, vector<1x32x32xbf16>
    %263 = vector.shape_cast %262 : vector<1x32x32xbf16> to vector<32x32xbf16>
    %cst_86 = arith.constant dense<0.000000e+00> : vector<8x32xf32>
    %264 = tpu.matmul %261, %263, %cst_86 {dimension_numbers = #tpu.dot_dimension_numbers<[1], [0], [0], [1], [0, 0, 1, 1], [], []>} : vector<8x32xbf16>, vector<32x32xbf16>, vector<8x32xf32> -> vector<8x32xf32>
    %c1_87 = arith.constant 1 : index
    %c0_88 = arith.constant 0 : index
    %c0_89 = arith.constant 0 : index
    %265 = vector.load %arg8[%c1_87, %c0_88, %c0_89] : memref<2x1x32xf32, #tpu.memory_space<vmem>>, vector<1x1x32xf32>
    %266 = vector.shape_cast %265 : vector<1x1x32xf32> to vector<1x32xf32>
    %267 = vector.broadcast %266 : vector<1x32xf32> to vector<8x32xf32>
    %268 = arith.addf %264, %267 : vector<8x32xf32>
    %269 = arith.addf %192, %268 : vector<8x32xf32>
    %c1_90 = arith.constant 1 : index
    %c0_91 = arith.constant 0 : index
    %c0_92 = arith.constant 0 : index
    %270 = vector.load %arg9[%c1_90, %c0_91, %c0_92] : memref<2x1x32xf32, #tpu.memory_space<vmem>>, vector<1x1x32xf32>
    %271 = vector.shape_cast %270 : vector<1x1x32xf32> to vector<1x32xf32>
    %c1_93 = arith.constant 1 : index
    %c0_94 = arith.constant 0 : index
    %c0_95 = arith.constant 0 : index
    %272 = vector.load %arg10[%c1_93, %c0_94, %c0_95] : memref<2x1x32xf32, #tpu.memory_space<vmem>>, vector<1x1x32xf32>
    %273 = vector.shape_cast %272 : vector<1x1x32xf32> to vector<1x32xf32>
    %cst_96 = arith.constant dense<0.000000e+00> : vector<8xf32>
    %274 = vector.multi_reduction <add>, %269, %cst_96 [1] : vector<8x32xf32> to vector<8xf32>
    %275 = vector.shape_cast %274 : vector<8xf32> to vector<8x1xf32>
    %cst_97 = arith.constant 3.200000e+01 : f32
    %276 = vector.broadcast %cst_97 : f32 to vector<8x1xf32>
    %277 = arith.divf %275, %276 : vector<8x1xf32>
    %278 = vector.broadcast %277 : vector<8x1xf32> to vector<8x32xf32>
    %279 = arith.subf %269, %278 : vector<8x32xf32>
    %280 = vector.broadcast %277 : vector<8x1xf32> to vector<8x32xf32>
    %281 = arith.subf %269, %280 : vector<8x32xf32>
    %282 = arith.mulf %279, %281 : vector<8x32xf32>
    %cst_98 = arith.constant dense<0.000000e+00> : vector<8xf32>
    %283 = vector.multi_reduction <add>, %282, %cst_98 [1] : vector<8x32xf32> to vector<8xf32>
    %284 = vector.shape_cast %283 : vector<8xf32> to vector<8x1xf32>
    %cst_99 = arith.constant 3.200000e+01 : f32
    %285 = vector.broadcast %cst_99 : f32 to vector<8x1xf32>
    %286 = arith.divf %284, %285 : vector<8x1xf32>
    %287 = vector.broadcast %277 : vector<8x1xf32> to vector<8x32xf32>
    %288 = arith.subf %269, %287 : vector<8x32xf32>
    %cst_100 = arith.constant 9.99999996E-13 : f32
    %289 = vector.broadcast %cst_100 : f32 to vector<8x1xf32>
    %290 = arith.addf %286, %289 : vector<8x1xf32>
    %291 = math.rsqrt %290 : vector<8x1xf32>
    %292 = vector.broadcast %291 : vector<8x1xf32> to vector<8x32xf32>
    %293 = arith.mulf %288, %292 : vector<8x32xf32>
    %294 = vector.broadcast %271 : vector<1x32xf32> to vector<8x32xf32>
    %295 = arith.mulf %293, %294 : vector<8x32xf32>
    %296 = vector.broadcast %273 : vector<1x32xf32> to vector<8x32xf32>
    %297 = arith.addf %295, %296 : vector<8x32xf32>
    %298 = arith.truncf %297 : vector<8x32xf32> to vector<8x32xbf16>
    %c1_101 = arith.constant 1 : index
    %c0_102 = arith.constant 0 : index
    %c0_103 = arith.constant 0 : index
    %299 = vector.load %arg11[%c1_101, %c0_102, %c0_103] : memref<2x32x64xbf16, #tpu.memory_space<vmem>>, vector<1x32x64xbf16>
    %300 = vector.shape_cast %299 : vector<1x32x64xbf16> to vector<32x64xbf16>
    %cst_104 = arith.constant dense<0.000000e+00> : vector<8x64xf32>
    %301 = tpu.matmul %298, %300, %cst_104 {dimension_numbers = #tpu.dot_dimension_numbers<[1], [0], [0], [1], [0, 0, 1, 1], [], []>} : vector<8x32xbf16>, vector<32x64xbf16>, vector<8x64xf32> -> vector<8x64xf32>
    %c1_105 = arith.constant 1 : index
    %c0_106 = arith.constant 0 : index
    %c0_107 = arith.constant 0 : index
    %302 = vector.load %arg12[%c1_105, %c0_106, %c0_107] : memref<2x1x64xf32, #tpu.memory_space<vmem>>, vector<1x1x64xf32>
    %303 = vector.shape_cast %302 : vector<1x1x64xf32> to vector<1x64xf32>
    %304 = vector.broadcast %303 : vector<1x64xf32> to vector<8x64xf32>
    %305 = arith.addf %301, %304 : vector<8x64xf32>
    %cst_108 = arith.constant 5.000000e-01 : f32
    %306 = vector.broadcast %cst_108 : f32 to vector<8x64xf32>
    %307 = arith.mulf %306, %305 : vector<8x64xf32>
    %cst_109 = arith.constant 4.471500e-02 : f32
    %308 = vector.broadcast %cst_109 : f32 to vector<8x64xf32>
    %309 = arith.mulf %308, %305 : vector<8x64xf32>
    %310 = arith.mulf %309, %305 : vector<8x64xf32>
    %311 = arith.mulf %310, %305 : vector<8x64xf32>
    %312 = arith.addf %305, %311 : vector<8x64xf32>
    %cst_110 = arith.constant 0.797884583 : f32
    %313 = vector.broadcast %cst_110 : f32 to vector<8x64xf32>
    %314 = arith.mulf %313, %312 : vector<8x64xf32>
    %315 = math.tanh %314 : vector<8x64xf32>
    %cst_111 = arith.constant 1.000000e+00 : f32
    %316 = vector.broadcast %cst_111 : f32 to vector<8x64xf32>
    %317 = arith.addf %316, %315 : vector<8x64xf32>
    %318 = arith.mulf %307, %317 : vector<8x64xf32>
    %319 = arith.truncf %318 : vector<8x64xf32> to vector<8x64xbf16>
    %c1_112 = arith.constant 1 : index
    %c0_113 = arith.constant 0 : index
    %c0_114 = arith.constant 0 : index
    %320 = vector.load %arg13[%c1_112, %c0_113, %c0_114] : memref<2x64x32xbf16, #tpu.memory_space<vmem>>, vector<1x64x32xbf16>
    %321 = vector.shape_cast %320 : vector<1x64x32xbf16> to vector<64x32xbf16>
    %cst_115 = arith.constant dense<0.000000e+00> : vector<8x32xf32>
    %322 = tpu.matmul %319, %321, %cst_115 {dimension_numbers = #tpu.dot_dimension_numbers<[1], [0], [0], [1], [0, 0, 1, 1], [], []>} : vector<8x64xbf16>, vector<64x32xbf16>, vector<8x32xf32> -> vector<8x32xf32>
    %c1_116 = arith.constant 1 : index
    %c0_117 = arith.constant 0 : index
    %c0_118 = arith.constant 0 : index
    %323 = vector.load %arg14[%c1_116, %c0_117, %c0_118] : memref<2x1x32xf32, #tpu.memory_space<vmem>>, vector<1x1x32xf32>
    %324 = vector.shape_cast %323 : vector<1x1x32xf32> to vector<1x32xf32>
    %325 = vector.broadcast %324 : vector<1x32xf32> to vector<8x32xf32>
    %326 = arith.addf %322, %325 : vector<8x32xf32>
    %327 = arith.addf %297, %326 : vector<8x32xf32>
    %c1_119 = arith.constant 1 : index
    %c0_120 = arith.constant 0 : index
    %c0_121 = arith.constant 0 : index
    %328 = vector.load %arg15[%c1_119, %c0_120, %c0_121] : memref<2x1x32xf32, #tpu.memory_space<vmem>>, vector<1x1x32xf32>
    %329 = vector.shape_cast %328 : vector<1x1x32xf32> to vector<1x32xf32>
    %c1_122 = arith.constant 1 : index
    %c0_123 = arith.constant 0 : index
    %c0_124 = arith.constant 0 : index
    %330 = vector.load %arg16[%c1_122, %c0_123, %c0_124] : memref<2x1x32xf32, #tpu.memory_space<vmem>>, vector<1x1x32xf32>
    %331 = vector.shape_cast %330 : vector<1x1x32xf32> to vector<1x32xf32>
    %cst_125 = arith.constant dense<0.000000e+00> : vector<8xf32>
    %332 = vector.multi_reduction <add>, %327, %cst_125 [1] : vector<8x32xf32> to vector<8xf32>
    %333 = vector.shape_cast %332 : vector<8xf32> to vector<8x1xf32>
    %cst_126 = arith.constant 3.200000e+01 : f32
    %334 = vector.broadcast %cst_126 : f32 to vector<8x1xf32>
    %335 = arith.divf %333, %334 : vector<8x1xf32>
    %336 = vector.broadcast %335 : vector<8x1xf32> to vector<8x32xf32>
    %337 = arith.subf %327, %336 : vector<8x32xf32>
    %338 = vector.broadcast %335 : vector<8x1xf32> to vector<8x32xf32>
    %339 = arith.subf %327, %338 : vector<8x32xf32>
    %340 = arith.mulf %337, %339 : vector<8x32xf32>
    %cst_127 = arith.constant dense<0.000000e+00> : vector<8xf32>
    %341 = vector.multi_reduction <add>, %340, %cst_127 [1] : vector<8x32xf32> to vector<8xf32>
    %342 = vector.shape_cast %341 : vector<8xf32> to vector<8x1xf32>
    %cst_128 = arith.constant 3.200000e+01 : f32
    %343 = vector.broadcast %cst_128 : f32 to vector<8x1xf32>
    %344 = arith.divf %342, %343 : vector<8x1xf32>
    %345 = vector.broadcast %335 : vector<8x1xf32> to vector<8x32xf32>
    %346 = arith.subf %327, %345 : vector<8x32xf32>
    %cst_129 = arith.constant 9.99999996E-13 : f32
    %347 = vector.broadcast %cst_129 : f32 to vector<8x1xf32>
    %348 = arith.addf %344, %347 : vector<8x1xf32>
    %349 = math.rsqrt %348 : vector<8x1xf32>
    %350 = vector.broadcast %349 : vector<8x1xf32> to vector<8x32xf32>
    %351 = arith.mulf %346, %350 : vector<8x32xf32>
    %352 = vector.broadcast %329 : vector<1x32xf32> to vector<8x32xf32>
    %353 = arith.mulf %351, %352 : vector<8x32xf32>
    %354 = vector.broadcast %331 : vector<1x32xf32> to vector<8x32xf32>
    %355 = arith.addf %353, %354 : vector<8x32xf32>
    %356 = vector.extract_strided_slice %355 {offsets = [0, 0], sizes = [1, 32], strides = [1, 1]} : vector<8x32xf32> to vector<1x32xf32>
    %357 = arith.truncf %356 : vector<1x32xf32> to vector<1x32xbf16>
    %c0_130 = arith.constant 0 : index
    %c0_131 = arith.constant 0 : index
    %358 = vector.load %arg17[%c0_130, %c0_131] : memref<32x32xbf16, #tpu.memory_space<vmem>>, vector<32x32xbf16>
    %cst_132 = arith.constant dense<0.000000e+00> : vector<1x32xf32>
    %359 = tpu.matmul %357, %358, %cst_132 {dimension_numbers = #tpu.dot_dimension_numbers<[1], [0], [0], [1], [0, 0, 1, 1], [], []>} : vector<1x32xbf16>, vector<32x32xbf16>, vector<1x32xf32> -> vector<1x32xf32>
    %c0_133 = arith.constant 0 : index
    %c0_134 = arith.constant 0 : index
    %360 = vector.load %arg18[%c0_133, %c0_134] : memref<1x32xf32, #tpu.memory_space<vmem>>, vector<1x32xf32>
    %361 = arith.addf %359, %360 : vector<1x32xf32>
    %362 = math.tanh %361 : vector<1x32xf32>
    %363 = arith.truncf %362 : vector<1x32xf32> to vector<1x32xbf16>
    %c0_135 = arith.constant 0 : index
    %c0_136 = arith.constant 0 : index
    %364 = vector.load %arg19[%c0_135, %c0_136] : memref<32x128xbf16, #tpu.memory_space<vmem>>, vector<32x128xbf16>
    %cst_137 = arith.constant dense<0.000000e+00> : vector<1x128xf32>
    %365 = tpu.matmul %363, %364, %cst_137 {dimension_numbers = #tpu.dot_dimension_numbers<[1], [0], [0], [1], [0, 0, 1, 1], [], []>} : vector<1x32xbf16>, vector<32x128xbf16>, vector<1x128xf32> -> vector<1x128xf32>
    %c0_138 = arith.constant 0 : index
    %c0_139 = arith.constant 0 : index
    %366 = vector.load %arg20[%c0_138, %c0_139] : memref<1x128xf32, #tpu.memory_space<vmem>>, vector<1x128xf32>
    %367 = arith.addf %365, %366 : vector<1x128xf32>
    %368 = vector.shape_cast %367 : vector<1x128xf32> to vector<1x1x128xf32>
    %369 = vector.broadcast %368 : vector<1x1x128xf32> to vector<1x8x128xf32>
    %c0_140 = arith.constant 0 : index
    %c0_141 = arith.constant 0 : index
    %c0_142 = arith.constant 0 : index
    %370 = vector.load %arg21[%c0_140, %c0_141, %c0_142] : memref<1x8x128xf32, #tpu.memory_space<vmem>>, vector<1x8x128xf32>
    tpu.vector_store %arg21[%c0_140, %c0_141, %c0_142], %369 {strides = array<i32>} : memref<1x8x128xf32, #tpu.memory_space<vmem>>, vector<1x8x128xf32>,
    return
  }
  func.func @transform_0(%arg0: i32) -> (i32, i32, i32) {
    %c0_i32 = arith.constant 0 : i32
    %c0_i32_0 = arith.constant 0 : i32
    %c0_i32_1 = arith.constant 0 : i32
    return %arg0, %c0_i32, %c0_i32_0 : i32, i32, i32
  }
  func.func @transform_1(%arg0: i32) -> (i32, i32, i32) {
    %c0_i32 = arith.constant 0 : i32
    %c0_i32_0 = arith.constant 0 : i32
    %c0_i32_1 = arith.constant 0 : i32
    return %arg0, %c0_i32, %c0_i32_0 : i32, i32, i32
  }
  func.func @transform_2(%arg0: i32) -> (i32, i32) {
    %c0_i32 = arith.constant 0 : i32
    %c0_i32_0 = arith.constant 0 : i32
    %c0_i32_1 = arith.constant 0 : i32
    return %c0_i32, %c0_i32_0 : i32, i32
  }
  func.func @transform_3(%arg0: i32) -> (i32, i32) {
    %c0_i32 = arith.constant 0 : i32
    %c0_i32_0 = arith.constant 0 : i32
    %c0_i32_1 = arith.constant 0 : i32
    return %c0_i32, %c0_i32_0 : i32, i32
  }
  func.func @transform_4(%arg0: i32) -> (i32, i32, i32) {
    %c0_i32 = arith.constant 0 : i32
    %c0_i32_0 = arith.constant 0 : i32
    %c0_i32_1 = arith.constant 0 : i32
    %c0_i32_2 = arith.constant 0 : i32
    return %c0_i32, %c0_i32_0, %c0_i32_1 : i32, i32, i32
  }
  func.func @transform_5(%arg0: i32) -> (i32, i32, i32) {
    %c0_i32 = arith.constant 0 : i32
    %c0_i32_0 = arith.constant 0 : i32
    %c0_i32_1 = arith.constant 0 : i32
    %c0_i32_2 = arith.constant 0 : i32
    return %c0_i32, %c0_i32_0, %c0_i32_1 : i32, i32, i32
  }
  func.func @transform_6(%arg0: i32) -> (i32, i32, i32) {
    %c0_i32 = arith.constant 0 : i32
    %c0_i32_0 = arith.constant 0 : i32
    %c0_i32_1 = arith.constant 0 : i32
    %c0_i32_2 = arith.constant 0 : i32
    return %c0_i32, %c0_i32_0, %c0_i32_1 : i32, i32, i32
  }
  func.func @transform_7(%arg0: i32) -> (i32, i32, i32) {
    %c0_i32 = arith.constant 0 : i32
    %c0_i32_0 = arith.constant 0 : i32
    %c0_i32_1 = arith.constant 0 : i32
    %c0_i32_2 = arith.constant 0 : i32
    return %c0_i32, %c0_i32_0, %c0_i32_1 : i32, i32, i32
  }
  func.func @transform_8(%arg0: i32) -> (i32, i32, i32) {
    %c0_i32 = arith.constant 0 : i32
    %c0_i32_0 = arith.constant 0 : i32
    %c0_i32_1 = arith.constant 0 : i32
    %c0_i32_2 = arith.constant 0 : i32
    return %c0_i32, %c0_i32_0, %c0_i32_1 : i32, i32, i32
  }
  func.func @transform_9(%arg0: i32) -> (i32, i32, i32) {
    %c0_i32 = arith.constant 0 : i32
    %c0_i32_0 = arith.constant 0 : i32
    %c0_i32_1 = arith.constant 0 : i32
    %c0_i32_2 = arith.constant 0 : i32
    return %c0_i32, %c0_i32_0, %c0_i32_1 : i32, i32, i32
  }
  func.func @transform_10(%arg0: i32) -> (i32, i32, i32) {
    %c0_i32 = arith.constant 0 : i32
    %c0_i32_0 = arith.constant 0 : i32
    %c0_i32_1 = arith.constant 0 : i32
    %c0_i32_2 = arith.constant 0 : i32
    return %c0_i32, %c0_i32_0, %c0_i32_1 : i32, i32, i32
  }
  func.func @transform_11(%arg0: i32) -> (i32, i32, i32) {
    %c0_i32 = arith.constant 0 : i32
    %c0_i32_0 = arith.constant 0 : i32
    %c0_i32_1 = arith.constant 0 : i32
    %c0_i32_2 = arith.constant 0 : i32
    return %c0_i32, %c0_i32_0, %c0_i32_1 : i32, i32, i32
  }
  func.func @transform_12(%arg0: i32) -> (i32, i32, i32) {
    %c0_i32 = arith.constant 0 : i32
    %c0_i32_0 = arith.constant 0 : i32
    %c0_i32_1 = arith.constant 0 : i32
    %c0_i32_2 = arith.constant 0 : i32
    return %c0_i32, %c0_i32_0, %c0_i32_1 : i32, i32, i32
  }
  func.func @transform_13(%arg0: i32) -> (i32, i32, i32) {
    %c0_i32 = arith.constant 0 : i32
    %c0_i32_0 = arith.constant 0 : i32
    %c0_i32_1 = arith.constant 0 : i32
    %c0_i32_2 = arith.constant 0 : i32
    return %c0_i32, %c0_i32_0, %c0_i32_1 : i32, i32, i32
  }
  func.func @transform_14(%arg0: i32) -> (i32, i32, i32) {
    %c0_i32 = arith.constant 0 : i32
    %c0_i32_0 = arith.constant 0 : i32
    %c0_i32_1 = arith.constant 0 : i32
    %c0_i32_2 = arith.constant 0 : i32
    return %c0_i32, %c0_i32_0, %c0_i32_1 : i32, i32, i32
  }
  func.func @transform_15(%arg0: i32) -> (i32, i32, i32) {
    %c0_i32 = arith.constant 0 : i32
    %c0_i32_0 = arith.constant 0 : i32
    %c0_i32_1 = arith.constant 0 : i32
    %c0_i32_2 = arith.constant 0 : i32
    return %c0_i32, %c0_i32_0, %c0_i32_1 : i32, i32, i32
  }
  func.func @transform_16(%arg0: i32) -> (i32, i32) {
    %c0_i32 = arith.constant 0 : i32
    %c0_i32_0 = arith.constant 0 : i32
    %c0_i32_1 = arith.constant 0 : i32
    return %c0_i32, %c0_i32_0 : i32, i32
  }
  func.func @transform_17(%arg0: i32) -> (i32, i32) {
    %c0_i32 = arith.constant 0 : i32
    %c0_i32_0 = arith.constant 0 : i32
    %c0_i32_1 = arith.constant 0 : i32
    return %c0_i32, %c0_i32_0 : i32, i32
  }
  func.func @transform_18(%arg0: i32) -> (i32, i32) {
    %c0_i32 = arith.constant 0 : i32
    %c0_i32_0 = arith.constant 0 : i32
    %c0_i32_1 = arith.constant 0 : i32
    return %c0_i32, %c0_i32_0 : i32, i32
  }
  func.func @transform_19(%arg0: i32) -> (i32, i32) {
    %c0_i32 = arith.constant 0 : i32
    %c0_i32_0 = arith.constant 0 : i32
    %c0_i32_1 = arith.constant 0 : i32
    return %c0_i32, %c0_i32_0 : i32, i32
  }
  func.func @transform_20(%arg0: i32) -> (i32, i32, i32) {
    %c0_i32 = arith.constant 0 : i32
    %c0_i32_0 = arith.constant 0 : i32
    %c0_i32_1 = arith.constant 0 : i32
    return %arg0, %c0_i32, %c0_i32_0 : i32, i32, i32
  }
}

</mosaic_0001>

<bundles_post_ra>
// kernel: bert_forward.1
= control target key start
LH: loop header
LB: loop body
LE: loop exit
PB: predicated region body
PF: predicated region fallthrough
CT: control target
= control target key end

     0   :  { %s2553_s0 = inlined_call_operand.vmem [shape: f32[2,8,32], index: 0, kind: input, shape index: {}]   ;;  %s2554_s1 = inlined_call_operand.vmem [shape: f32[2,1,8], index: 1, kind: input, shape index: {}]   ;;  %s2555_s2 = inlined_call_operand.vmem [shape: f32[1,32], index: 2, kind: input, shape index: {}]   ;;  %s2556_s3 = inlined_call_operand.vmem [shape: f32[1,32], index: 3, kind: input, shape index: {}]   ;;  %s2557_s4 = inlined_call_operand.vmem [shape: bf16[2,32,96], index: 4, kind: input, shape index: {}]   ;;  %s2558_s5 = inlined_call_operand.vmem [shape: f32[2,1,96], index: 5, kind: input, shape index: {}]   ;;  %s2559_s6 = inlined_call_operand.vmem [shape: bf16[2,32,32], index: 6, kind: input, shape index: {}]   ;;  %s2560_s7 = inlined_call_operand.vmem [shape: f32[2,1,32], index: 7, kind: input, shape index: {}]   ;;  %s2561_s8 = inlined_call_operand.vmem [shape: f32[2,1,32], index: 8, kind: input, shape index: {}]   ;;  %s2562_s9 = inlined_call_operand.vmem [shape: f32[2,1,32], index: 9, kind: input, shape index: {}]   ;;  %s2563_s10 = inlined_call_operand.vmem [shape: bf16[2,32,64], index: 10, kind: input, shape index: {}]   ;;  %s2564_s11 = inlined_call_operand.vmem [shape: f32[2,1,64], index: 11, kind: input, shape index: {}]   ;;  %s2565_s12 = inlined_call_operand.vmem [shape: bf16[2,64,32], index: 12, kind: input, shape index: {}]   ;;  %s2566_s13 = inlined_call_operand.vmem [shape: f32[2,1,32], index: 13, kind: input, shape index: {}]   ;;  %s2567_s14 = inlined_call_operand.vmem [shape: f32[2,1,32], index: 14, kind: input, shape index: {}]   ;;  %s2568_s15 = inlined_call_operand.vmem [shape: f32[2,1,32], index: 15, kind: input, shape index: {}]   ;;  %s2569_s16 = inlined_call_operand.vmem [shape: bf16[32,32], index: 16, kind: input, shape index: {}]   ;;  %s2570_s17 = inlined_call_operand.vmem [shape: f32[1,32], index: 17, kind: input, shape index: {}]   ;;  %s2571_s18 = inlined_call_operand.vmem [shape: bf16[32,128], index: 18, kind: input, shape index: {}]   ;;  %s2572_s19 = inlined_call_operand.vmem [shape: f32[1,128], index: 19, kind: input, shape index: {}]   ;;  %s2573_s20 = inlined_call_operand.vmem [shape: f32[2,8,128], index: 20, kind: output, shape index: {}]  }
   0x1   :  { %2586 = sst [smem:[#allocation2_spill]] %s2553_s0 }
   0x2   :  { %2587 = sst [smem:[#allocation3_spill]] %s2554_s1  ;;  %s2234_s1 = smov 0  }
   0x3   :  { %2588 = sst [smem:[#allocation4_spill]] %s2555_s2 }
   0x4   :  { %2589 = sst [smem:[#allocation5_spill]] %s2556_s3 }
   0x5   :  { %2590 = sst [smem:[#allocation6_spill]] %s2557_s4 }
   0x6 LB: > { %s1843_s22 = sadd.s32 4294967295, %s2118_s1   ;;  %p1847_p0 = scmp.ge.s32.totalorder %s2118_s1, 1  ;;  %s2118_s1 = sphi %s2234_s1, %s30_s1  }
   0x7   : > { %p569_p1 = scmp.lt.s32.totalorder %s2118_s1, 3 }
   0x9   : > { %p570_p2 = pnand %p1847_p0, %p569_p1 }
   0xa   : > { %p628_p3 = scmp.lt.s32.totalorder (!%p570_p2), %s1843_s22, 1  ;;  %s2591_s25 = sld [smem:[#allocation3_spill]] (!%p570_p2) }
   0xb   : > { %573 = sbr.rel (%p570_p2) target bundleno = 4531 (0x11b3), region = 100  ;;  %s2592_s28 = sld [smem:[#allocation2_spill]] (!%p570_p2) }
   0xc   : > { %s2593_s0 = sld [smem:[#allocation6_spill]] (!%p570_p2)  ;;  %s2121_s24 = smov (!%p570_p2), 104  }
   0xd   : > { %s2594_s27 = sld [smem:[#allocation4_spill]] (!%p570_p2)  ;;  %s2584_s2 = smov (!%p570_p2), 120  }
   0xe   : > { %s2595_s29 = sld [smem:[#allocation5_spill]] (!%p570_p2)  ;;  %s2585_s26 = smov (!%p570_p2), 112  }
   0xf   : > { %s2579_s30 = smov (!%p570_p2), 24   ;;  %s2578_s21 = smov (!%p570_p2), 16  }
  0x10   : > { %s2605_s22 = smov (!%p628_p3, %s1843_s22), 1  ;;  %vm644_vm0 = vcmask 261120   ;;  %v2120_v2 = vmov 32.0   ;;  %v2046_v32 = vld [vmem:[%s2558_s5] ss:$0 sm:$0xff]  ;;  %vm738_vm5 = vcmask 64512  }
  0x11   : > { %s2576_s23 = sshll.u32 %s2605_s22, 3  ;;  %s634_s3 = scalar_lea.vmem %s2591_s25, %s2605_s22  ;;  %2062 = vrcp.f32 %v2120_v2  ;;  %vm894_vm6 = vcmask 1043456   ;;  %vm987_vm7 = vcmask 130048   ;;  %vm989_vm8 = vcmask 195584  }
  0x12   : > { %s631_s4 = scalar_lea.vmem %s2592_s28, %s2576_s23  ;;  %v2003_v14 = vld [vmem:[%s2593_s0 + $0x8] sm:$0xff]  ;;  %v2002_v15 = vld [vmem:[%s2593_s0] sm:$0xff]  ;;  %vm1144_vm12 = vcmask 523264   ;;  %s2601_s23 = smov 24  }
  0x13   : > { %v641_v0 = vld [vmem:[%s631_s4] sm:$0xff]  ;;  %712 = vmatpush.bf16.msra.mxu0 %v2003_v14 }
  0x14   : > { %v645_v1 = vsel %vm644_vm0, %v641_v0, 0.0  ;;  %v2044_v25 = vld [vmem:[%s2594_s27] ss:$0 sm:$0xff]  ;;  %s2582_s27 = smov 96  }
  0x15   : > { %646 = vadd.xlane.f32.xlu0 %v645_v1  ;;  %v2045_v28 = vld [vmem:[%s2595_s29] ss:$0 sm:$0xff]  ;;  %s2577_s29 = smov 8  }
  0x16   : > { %v2309_v59 = vld [vmem:[%s634_s3] ss:$0 sm:$0xff]  ;;  %s2580_s3 = smov 64  }
  0x17   : > { %v2063_v3 = vpop.eup %2062  ;;  %713 = vmatpush.bf16.msra.mxu0 %v2002_v15 }
  0x18   : > { %v649_v4 = vmul.f32 32.0, %v2063_v3  ;;  %vm653_vm1 = vweird.f32 %v2063_v3 }
  0x1a   : > { %v650_v5 = vsub.f32 1.0, %v649_v4 }
  0x1c   : > { %v651_v6 = vmul.f32 %v2063_v3, %v650_v5 }
  0x1e   : > { %v652_v7 = vadd.f32 %v2063_v3, %v651_v6 }
  0x20   : > { %v2255_v8 = vsel %vm653_vm1, %v2063_v3, %v652_v7 }
  0x88   : > { %v647_v9 = vpop.xlane.xlu0 %646 }
  0x89   : > { %v655_v10 = vmul.f32 %v2255_v8, %v647_v9 }
  0x8b   : > { %v656_v11 = vsub.f32 %v641_v0, %v655_v10 }
  0x8d   : > { %v657_v12 = vmul.f32 %v656_v11, %v656_v11 }
  0x8f   : > { %v658_v13 = vsel %vm644_vm0, %v657_v12, 0.0 }
  0x90   : > { %659 = vadd.xlane.f32.xlu0 %v658_v13 }
 0x103   : > { %v660_v16 = vpop.xlane.xlu0 %659 }
 0x104   : > { %v661_v17 = vmul.f32 %v660_v16, %v2255_v8 }
 0x106   : > { %v662_v18 = vadd.f32 1e-12, %v661_v17 }
 0x108   : > { %2064 = vrsqrt.f32 %v662_v18  ;;  %vm669_vm3 = vweird.f32 %v662_v18 }
 0x10e   : > { %v2065_v19 = vpop.eup %2064 }
 0x10f   : > { %v664_v20 = vmul.f32 %v2065_v19, %v662_v18  ;;  %vm670_vm2 = vweird.f32 %v2065_v19 }
 0x110   : > { %vm671_vm4 = vmor %vm669_vm3, %vm670_vm2 }
 0x111   : > { %v665_v21 = vmul.f32 %v2065_v19, %v664_v20 }
 0x113   : > { %v666_v22 = vmul.f32 0.5, %v665_v21 }
 0x115   : > { %v667_v23 = vsub.f32 1.5, %v666_v22 }
 0x117   : > { %v668_v24 = vmul.f32 %v2065_v19, %v667_v23 }
 0x119   : > { %v672_v26 = vsel %vm671_vm4, %v2065_v19, %v668_v24 }
 0x11a   : > { %v673_v27 = vmul.f32 %v672_v26, %v656_v11 }
 0x11c   : > { %v677_v29 = vmul.f32 %v2044_v25, %v673_v27 }
 0x11e   : > { %v2272_v30 = vadd.f32 %v2045_v28, %v677_v29 }
 0x120   : > { %v682_v31 = vpack.c.bf16 %v2272_v30, %v2272_v30 }
 0x122   : > { %1858 = vmatmul.msk.bf16.vlgmr.msra.gmra.mxu0 %vm644_vm0, %v682_v31 }
 0x19f   : > { %v715_v33 = vpop.f32.mrf.mxu0 }
 0x1a0   : > { %v716_v34 = vadd.f32 %v2046_v32, %v715_v33 }
 0x1a2   : > { %726 = vrot.lane.b32.xlu2 %v716_v34, %s2121_s24  ;;  %720 = vrot.lane.b32.xlu1 %v716_v34, %s2584_s2  ;;  %v729_v44 = vpack.c.bf16 %v716_v34, %v716_v34 }
 0x1a4   : > { %v734_v47 = vunpack.c.l.b16 %v729_v44 }
 0x1a6   : > { %v2290_v50 = vpack.c.b16 %v734_v47, %v734_v47 }
 0x1a7   : > { %v717_v35 = vpop.f32.mrf.mxu0 }
 0x1aa   : > { %723 = vrot.lane.b32.xlu1 %v716_v34, %s2585_s26  ;;  %s2596_s26 = smov 112  }
 0x1fc   : > { %v727_v36 = vpop.permute.xlu2 %726 }
 0x1fd   : > { %v732_v37 = vpack.c.bf16 %v727_v36, %v727_v36 }
 0x1ff   : > { %v807_v38 = vunpack.c.l.b16 %v732_v37 }
 0x201   : > { %v2283_v39 = vpack.c.b16 %v807_v38, %v807_v38 }
 0x203   : > { %809 = vrot.lane.b32.xlu1 %v2283_v39, %s2582_s27 }
 0x214   : > { %v721_v40 = vpop.permute.xlu1 %720 }
 0x215   : > { %v730_v41 = vpack.c.bf16 %v721_v40, %v721_v40 }
 0x217   : > { %v759_v42 = vunpack.c.l.b16 %v730_v41 }
 0x219   : > { %v760_v43 = vpack.c.b16 %v759_v42, %v759_v42 }
 0x21b   : > { %761 = vrot.lane.b32.xlu2 %v760_v43, %s2582_s27 }
 0x21c   : > { %v724_v45 = vpop.permute.xlu1 %723 }
 0x21d   : > { %v731_v46 = vpack.c.bf16 %v724_v45, %v724_v45 }
 0x21f   : > { %v783_v48 = vunpack.c.l.b16 %v731_v46 }
 0x221   : > { %v2288_v49 = vpack.c.b16 %v783_v48, %v783_v48 }
 0x223   : > { %785 = vrot.lane.b32.xlu0 %v2288_v49, %s2582_s27  ;;  %736 = vrot.lane.b32.xlu2 %v2290_v50, %s2582_s27 }
 0x275   : > { %v762_v51 = vpop.permute.xlu2 %761  ;;  %v810_v52 = vpop.permute.xlu1 %809 }
 0x276   : > { %v767_v53 = vsel %vm738_vm5, %v762_v51, 0  ;;  %v815_v54 = vsel %vm738_vm5, %v810_v52, 0 }
 0x277   : > { %776 = vmatpush.bf16.xpose.msra.mxu2 %v767_v53  ;;  %824 = vmatpush.bf16.xpose.msrb.mxu0 %v815_v54 }
 0x27d   : > { %v737_v55 = vpop.permute.xlu2 %736 }
 0x27e   : > { %1860 = vmatmul.msk.bf16.vlgmr.msra.gmra.mxu2 %vm738_vm5, %v730_v41  ;;  %1862 = vmatmul.msk.bf16.vlgmr.msrb.gmra.mxu0 %vm738_vm5, %v732_v37  ;;  %v743_v56 = vsel %vm738_vm5, %v737_v55, 0 }
 0x27f   : > { %752 = vmatpush.bf16.xpose.msra.mxu1 %v743_v56 }
 0x286   : > { %1859 = vmatmul.msk.bf16.vlgmr.msra.gmra.mxu1 %vm738_vm5, %v729_v44 }
 0x295   : > { %v786_v57 = vpop.permute.xlu0 %785 }
 0x296   : > { %v791_v58 = vsel %vm738_vm5, %v786_v57, 0 }
 0x297   : > { %800 = vmatpush.bf16.xpose.msra.mxu3 %v791_v58 }
 0x29e   : > { %1861 = vmatmul.msk.bf16.vlgmr.msra.gmra.mxu3 %vm738_vm5, %v731_v46 }
 0x2fb   : > { %v826_v60 = vpop.f32.mrf.mxu0 }
 0x2fc   : > { %v833_v61 = vmul.f32 0.35355338, %v826_v60 }
 0x2fe   : > { %v840_v62 = vadd.f32 %v2309_v59, %v833_v61 }
 0x300   : > { %v850_v63 = vsel %vm738_vm5, %v840_v62, -inf }
 0x301   : > { %v778_v0 = vpop.f32.mrf.mxu2  ;;  %851 = vmax.xlane.f32.xlu0 %v850_v63 }
 0x302   : > { %v831_v1 = vmul.f32 0.35355338, %v778_v0 }
 0x303   : > { %v754_v2 = vpop.f32.mrf.mxu1  ;;  %v828_v3 = vpop.f32.mrf.mxu0 }
 0x304   : > { %v838_v4 = vadd.f32 %v2309_v59, %v831_v1  ;;  %v830_v12 = vmul.f32 0.35355338, %v754_v2 }
 0x306   : > { %v844_v5 = vsel %vm738_vm5, %v838_v4, -inf  ;;  %v837_v15 = vadd.f32 %v2309_v59, %v830_v12 }
 0x307   : > { %845 = vmax.xlane.f32.xlu1 %v844_v5 }
 0x308   : > { %v841_v16 = vsel %vm738_vm5, %v837_v15, -inf }
 0x309   : > { %v780_v6 = vpop.f32.mrf.mxu2 }
 0x30b   : > { %v756_v7 = vpop.f32.mrf.mxu1 }
 0x30c   : > { %v2005_v7 = vld [vmem:[%s2559_s6 + $0x8] sm:$0xff] }
 0x315   : > { %911 = vrot.lane.b32.xlu0 %v760_v43, %s2580_s3 }
 0x321   : > { %v802_v9 = vpop.f32.mrf.mxu3 }
 0x322   : > { %v832_v10 = vmul.f32 0.35355338, %v802_v9  ;;  %v2004_v9 = vld [vmem:[%s2559_s6] sm:$0xff] }
 0x324   : > { %v839_v11 = vadd.f32 %v2309_v59, %v832_v10 }
 0x326   : > { %v847_v13 = vsel %vm738_vm5, %v839_v11, -inf }
 0x327   : > { %848 = vmax.xlane.f32.xlu2 %v847_v13 }
 0x329   : > { %v804_v14 = vpop.f32.mrf.mxu3 }
 0x32f   : > { %842 = vmax.xlane.f32.xlu2 %v841_v16 }
 0x374   : > { %v852_v17 = vpop.xlane.xlu0 %851 }
 0x375   : > { %v856_v18 = vsub.f32 %v840_v62, %v852_v17  ;;  %v2047_v17 = vld [vmem:[%s2560_s7] ss:$0 sm:$0xff] }
 0x377   : > { %v863_v19 = vmul.f32 1.442695, %v856_v18 }
 0x379   : > { %2066 = vpow2.f32 %v863_v19 }
 0x37a   : > { %v846_v20 = vpop.xlane.xlu1 %845 }
 0x37b   : > { %v854_v21 = vsub.f32 %v838_v4, %v846_v20 }
 0x37d   : > { %v859_v22 = vmul.f32 1.442695, %v854_v21 }
 0x37f   : > { %v2067_v23 = vpop.eup %2066  ;;  %2068 = vpow2.f32 %v859_v22 }
 0x380   : > { %v874_v24 = vsel %vm738_vm5, %v2067_v23, 0.0 }
 0x381   : > { %875 = vadd.xlane.f32.xlu1 %v874_v24 }
 0x385   : > { %v2069_v25 = vpop.eup %2068 }
 0x386   : > { %v868_v28 = vsel %vm738_vm5, %v2069_v25, 0.0 }
 0x387   : > { %v912_v26 = vpop.permute.xlu0 %911 }
 0x388   : > { %v917_v27 = vsel %vm894_vm6, %v912_v26, 0 }
 0x389   : > { %926 = vmatpush.bf16.msrb.mxu2 %v917_v27  ;;  %869 = vadd.xlane.f32.xlu1 %v868_v28  ;;  %v2007_v28 = vld [vmem:[%s2563_s10 + $0x8] sm:$0xff] }
 0x38d   : > { %1091 = vmatpush.bf16.msra.mxu2 %v2007_v28 }
 0x39a   : > { %v849_v29 = vpop.xlane.xlu2 %848 }
 0x39b   : > { %v855_v31 = vsub.f32 %v839_v11, %v849_v29 }
 0x39d   : > { %v861_v32 = vmul.f32 1.442695, %v855_v31 }
 0x39f   : > { %2070 = vpow2.f32 %v861_v32 }
 0x3a2   : > { %953 = vrot.lane.b32.xlu1 %v2283_v39, %s2580_s3  ;;  %v843_v33 = vpop.xlane.xlu2 %842 }
 0x3a3   : > { %v853_v34 = vsub.f32 %v837_v15, %v843_v33 }
 0x3a5   : > { %v2071_v35 = vpop.eup %2070  ;;  %v857_v36 = vmul.f32 1.442695, %v853_v34 }
 0x3a6   : > { %v871_v37 = vsel %vm738_vm5, %v2071_v35, 0.0 }
 0x3a7   : > { %2072 = vpow2.f32 %v857_v36  ;;  %872 = vadd.xlane.f32.xlu2 %v871_v37 }
 0x3ad   : > { %v2073_v38 = vpop.eup %2072 }
 0x3ae   : > { %v865_v40 = vsel %vm738_vm5, %v2073_v38, 0.0 }
 0x3af   : > { %866 = vadd.xlane.f32.xlu0 %v865_v40  ;;  %v2048_v40 = vld [vmem:[%s2561_s8] ss:$0 sm:$0xff] }
 0x3bf   : > { %932 = vrot.lane.b32.xlu2 %v2288_v49, %s2580_s3 }
 0x3c7   : > { %889 = vrot.lane.b32.xlu2 %v2290_v50, %s2580_s3  ;;  %s2597_s3 = smov 120  }
 0x3f4   : > { %v876_v41 = vpop.xlane.xlu1 %875 }
 0x3fc   : > { %v870_v39 = vpop.xlane.xlu1 %869 }
 0x3fd   : > { %2074 = vrcp.f32 %v870_v39  ;;  %v2049_v39 = vld [vmem:[%s2562_s9] ss:$0 sm:$0xff] }
 0x3fe   : > { %2076 = vrcp.f32 %v876_v41 }
 0x403   : > { %v2075_v42 = vpop.eup %2074 }
 0x404   : > { %v882_v43 = vmul.f32 %v2075_v42, %v2069_v25  ;;  %v2077_v45 = vpop.eup %2076 }
 0x405   : > { %v884_v46 = vmul.f32 %v2077_v45, %v2067_v23 }
 0x406   : > { %v886_v44 = vpack.c.bf16 %v882_v43, %v882_v43 }
 0x407   : > { %v888_v51 = vpack.c.bf16 %v884_v46, %v884_v46  ;;  %v2011_v46 = vld [vmem:[%s2565_s12 + $0x18] sm:$0xff] }
 0x408   : > { %1864 = vmatmul.msk.bf16.vlgmr.msrb.gmra.mxu2 %vm738_vm5, %v886_v44 }
 0x414   : > { %v954_v47 = vpop.permute.xlu1 %953 }
 0x415   : > { %v959_v48 = vsel %vm894_vm6, %v954_v47, 0  ;;  %v2010_v47 = vld [vmem:[%s2565_s12 + $0x10] sm:$0xff] }
 0x416   : > { %968 = vmatpush.bf16.msra.mxu0 %v959_v48  ;;  %v2009_v48 = vld [vmem:[%s2565_s12 + $0x8] sm:$0xff] }
 0x419   : > { %1866 = vmatmul.msk.bf16.vlgmr.msra.gmra.mxu0 %vm738_vm5, %v888_v51  ;;  %v2008_v51 = vld [vmem:[%s2565_s12] sm:$0xff] }
 0x41a   : > { %v873_v49 = vpop.xlane.xlu2 %872 }
 0x41b   : > { %2078 = vrcp.f32 %v873_v49  ;;  %v2050_v49 = vld [vmem:[%s2564_s11] ss:$0 sm:$0xff] }
 0x421   : > { %v2079_v50 = vpop.eup %2078 }
 0x422   : > { %v883_v52 = vmul.f32 %v2079_v50, %v2071_v35  ;;  %v867_v53 = vpop.xlane.xlu0 %866  ;;  %v933_v54 = vpop.permute.xlu2 %932 }
 0x423   : > { %2080 = vrcp.f32 %v867_v53  ;;  %v938_v55 = vsel %vm894_vm6, %v933_v54, 0 }
 0x424   : > { %947 = vmatpush.bf16.msrb.mxu3 %v938_v55  ;;  %v887_v56 = vpack.c.bf16 %v883_v52, %v883_v52 }
 0x427   : > { %1865 = vmatmul.msk.bf16.vlgmr.msrb.gmra.mxu3 %vm738_vm5, %v887_v56 }
 0x428   : > { %1152 = vmatpush.bf16.msra.mxu3 %v2011_v46 }
 0x429   : > { %v2081_v57 = vpop.eup %2080 }
 0x42a   : > { %v881_v58 = vmul.f32 %v2081_v57, %v2073_v38  ;;  %v890_v60 = vpop.permute.xlu2 %889 }
 0x42b   : > { %v896_v61 = vsel %vm894_vm6, %v890_v60, 0 }
 0x42c   : > { %905 = vmatpush.bf16.msrb.mxu1 %v896_v61  ;;  %v885_v62 = vpack.c.bf16 %v881_v58, %v881_v58  ;;  %1153 = vmatpush.bf16.msra.mxu3 %v2010_v47 }
 0x42f   : > { %1863 = vmatmul.msk.bf16.vlgmr.msrb.gmra.mxu1 %vm738_vm5, %v885_v62 }
 0x430   : > { %1021 = vmatpush.bf16.msra.mxu1 %v2005_v7  ;;  %1154 = vmatpush.bf16.msra.mxu3 %v2009_v48 }
 0x434   : > { %1022 = vmatpush.bf16.msra.mxu1 %v2004_v9  ;;  %1155 = vmatpush.bf16.msra.mxu3 %v2008_v51 }
 0x48b   : > { %v928_v63 = vpop.f32.mrf.mxu2 }
 0x48c   : > { %975 = vrot.lane.b32.xlu1 %v928_v63, %s2577_s29  ;;  %s2602_s29 = smov 16  }
 0x493   : > { %v930_v0 = vpop.f32.mrf.mxu2 }
 0x496   : > { %v970_v1 = vpop.f32.mrf.mxu0 }
 0x497   : > { %983 = vrot.lane.b32.xlu1 %v970_v1, %s2579_s30  ;;  %v2051_v1 = vld [vmem:[%s2566_s13] ss:$0 sm:$0xff]  ;;  %s2598_s30 = smov 96  }
 0x49e   : > { %v972_v2 = vpop.f32.mrf.mxu0 }
 0x4aa   : > { %v949_v3 = vpop.f32.mrf.mxu3 }
 0x4ab   : > { %979 = vrot.lane.b32.xlu2 %v949_v3, %s2578_s21  ;;  %s2600_s21 = smov 8  }
 0x4ac   : > { %v907_v4 = vpop.f32.mrf.mxu1 }
 0x4b2   : > { %v951_v5 = vpop.f32.mrf.mxu3 }
 0x4b4   : > { %v909_v6 = vpop.f32.mrf.mxu1 }
 0x4fe   : > { %v976_v10 = vpop.permute.xlu1 %975 }
 0x4ff   : > { %v986_v12 = vsel %vm738_vm5, %v907_v4, %v976_v10 }
 0x505   : > { %v980_v11 = vpop.permute.xlu2 %979 }
 0x506   : > { %v988_v13 = vsel %vm987_vm7, %v986_v12, %v980_v11 }
 0x509   : > { %v984_v14 = vpop.permute.xlu1 %983 }
 0x50a   : > { %v990_v15 = vsel %vm989_vm8, %v988_v13, %v984_v14  ;;  %v2013_v13 = vld [vmem:[%s2593_s0 + $0x18] sm:$0xff]  ;;  %v2012_v14 = vld [vmem:[%s2593_s0 + $0x10] sm:$0xff] }
 0x50b   : > { %v991_v16 = vpack.c.bf16 %v990_v15, %v990_v15  ;;  %1226 = vmatpush.bf16.msrb.mxu0 %v2013_v13 }
 0x50d   : > { %1875 = vmatmul.msk.bf16.vlgmr.msra.gmra.mxu1 %vm644_vm0, %v991_v16 }
 0x50f   : > { %1227 = vmatpush.bf16.msrb.mxu0 %v2012_v14 }
 0x58a   : > { %v1024_v18 = vpop.f32.mrf.mxu1 }
 0x58b   : > { %v1025_v19 = vadd.f32 %v2047_v17, %v1024_v18 }
 0x58d   : > { %v1028_v20 = vadd.f32 %v1025_v19, %v2272_v30  ;;  %v2006_v30 = vld [vmem:[%s2563_s10] sm:$0xff] }
 0x58e   : > { %1092 = vmatpush.bf16.msra.mxu2 %v2006_v30 }
 0x58f   : > { %v1031_v21 = vsel %vm644_vm0, %v1028_v20, 0.0 }
 0x590   : > { %1032 = vadd.xlane.f32.xlu2 %v1031_v21 }
 0x592   : > { %v1026_v22 = vpop.f32.mrf.mxu1 }
 0x603   : > { %v1033_v23 = vpop.xlane.xlu2 %1032 }
 0x604   : > { %v1034_v24 = vmul.f32 %v1033_v23, %v2255_v8 }
 0x606   : > { %v1035_v25 = vsub.f32 %v1028_v20, %v1034_v24  ;;  %v2052_v24 = vld [vmem:[%s2567_s14] ss:$0 sm:$0xff] }
 0x608   : > { %v1036_v26 = vmul.f32 %v1035_v25, %v1035_v25 }
 0x60a   : > { %v1037_v27 = vsel %vm644_vm0, %v1036_v26, 0.0  ;;  %v2053_v26 = vld [vmem:[%s2568_s15] ss:$0 sm:$0xff] }
 0x60b   : > { %1038 = vadd.xlane.f32.xlu1 %v1037_v27 }
 0x67e   : > { %v1039_v29 = vpop.xlane.xlu1 %1038 }
 0x67f   : > { %v1040_v31 = vmul.f32 %v1039_v29, %v2255_v8 }
 0x681   : > { %v1041_v32 = vadd.f32 1e-12, %v1040_v31  ;;  %v2054_v31 = vld [vmem:[%s2558_s5 + $0x1] ss:$0 sm:$0xff] }
 0x683   : > { %2082 = vrsqrt.f32 %v1041_v32  ;;  %vm1048_vm10 = vweird.f32 %v1041_v32 }
 0x689   : > { %v2083_v33 = vpop.eup %2082 }
 0x68a   : > { %v1043_v34 = vmul.f32 %v2083_v33, %v1041_v32  ;;  %vm1049_vm9 = vweird.f32 %v2083_v33 }
 0x68b   : > { %vm1050_vm11 = vmor %vm1048_vm10, %vm1049_vm9 }
 0x68c   : > { %v1044_v35 = vmul.f32 %v2083_v33, %v1043_v34 }
 0x68e   : > { %v1045_v36 = vmul.f32 0.5, %v1044_v35 }
 0x690   : > { %v1046_v37 = vsub.f32 1.5, %v1045_v36 }
 0x692   : > { %v1047_v38 = vmul.f32 %v2083_v33, %v1046_v37 }
 0x694   : > { %v1051_v41 = vsel %vm1050_vm11, %v2083_v33, %v1047_v38 }
 0x695   : > { %v1052_v42 = vmul.f32 %v1051_v41, %v1035_v25 }
 0x697   : > { %v1056_v43 = vmul.f32 %v2048_v40, %v1052_v42 }
 0x699   : > { %v1060_v44 = vadd.f32 %v2049_v39, %v1056_v43 }
 0x69b   : > { %v1061_v45 = vpack.c.bf16 %v1060_v44, %v1060_v44 }
 0x69d   : > { %1884 = vmatmul.msk.bf16.vlgmr.msra.gmra.mxu2 %vm644_vm0, %v1061_v45 }
 0x720   : > { %v1094_v50 = vpop.f32.mrf.mxu2 }
 0x721   : > { %v1095_v52 = vadd.f32 %v2050_v49, %v1094_v50 }
 0x723   : > { %v1099_v53 = vmul.f32 0.044715, %v1095_v52  ;;  %v1098_v61 = vmul.f32 0.5, %v1095_v52 }
 0x725   : > { %v1100_v54 = vmul.f32 %v1099_v53, %v1095_v52 }
 0x727   : > { %v1101_v55 = vmul.f32 %v1100_v54, %v1095_v52 }
 0x728   : > { %v1096_v56 = vpop.f32.mrf.mxu2 }
 0x729   : > { %v1102_v57 = vadd.f32 %v1101_v55, %v1095_v52 }
 0x72b   : > { %v1103_v58 = vmul.f32 0.7978846, %v1102_v57 }
 0x72d   : > { %2084 = vtanh.f32 %v1103_v58 }
 0x733   : > { %v2085_v60 = vpop.eup %2084 }
 0x734   : > { %v1105_v62 = vadd.f32 1.0, %v2085_v60 }
 0x736   : > { %v1106_v63 = vmul.f32 %v1105_v62, %v1098_v61 }
 0x738   : > { %v1107_v0 = vpack.c.bf16 %v1106_v63, %v1106_v63 }
 0x73a   : > { %1901 = vmatmul.msk.bf16.vlgmr.msra.gmra.mxu3 %vm1144_vm12, %v1107_v0 }
 0x7bd   : > { %v1157_v2 = vpop.f32.mrf.mxu3 }
 0x7be   : > { %v1158_v3 = vadd.f32 %v2051_v1, %v1157_v2 }
 0x7c0   : > { %v1161_v4 = vadd.f32 %v1158_v3, %v1060_v44 }
 0x7c2   : > { %v1164_v5 = vsel %vm644_vm0, %v1161_v4, 0.0 }
 0x7c3   : > { %1165 = vadd.xlane.f32.xlu0 %v1164_v5 }
 0x7c5   : > { %v1159_v6 = vpop.f32.mrf.mxu3 }
 0x836   : > { %v1166_v7 = vpop.xlane.xlu0 %1165 }
 0x837   : > { %v1167_v9 = vmul.f32 %v1166_v7, %v2255_v8 }
 0x839   : > { %v1168_v10 = vsub.f32 %v1161_v4, %v1167_v9 }
 0x83b   : > { %v1169_v11 = vmul.f32 %v1168_v10, %v1168_v10 }
 0x83d   : > { %v1170_v12 = vsel %vm644_vm0, %v1169_v11, 0.0 }
 0x83e   : > { %1171 = vadd.xlane.f32.xlu0 %v1170_v12 }
 0x8b1   : > { %v1172_v15 = vpop.xlane.xlu0 %1171 }
 0x8b2   : > { %v1173_v16 = vmul.f32 %v1172_v15, %v2255_v8 }
 0x8b4   : > { %v1174_v17 = vadd.f32 1e-12, %v1173_v16 }
 0x8b6   : > { %2086 = vrsqrt.f32 %v1174_v17  ;;  %vm1181_vm14 = vweird.f32 %v1174_v17 }
 0x8bc   : > { %v2087_v18 = vpop.eup %2086 }
 0x8bd   : > { %v1176_v19 = vmul.f32 %v2087_v18, %v1174_v17  ;;  %vm1182_vm13 = vweird.f32 %v2087_v18 }
 0x8be   : > { %vm1183_vm15 = vmor %vm1181_vm14, %vm1182_vm13 }
 0x8bf   : > { %v1177_v20 = vmul.f32 %v2087_v18, %v1176_v19 }
 0x8c1   : > { %v1178_v21 = vmul.f32 0.5, %v1177_v20 }
 0x8c3   : > { %v1179_v22 = vsub.f32 1.5, %v1178_v21 }
 0x8c5   : > { %v1180_v23 = vmul.f32 %v2087_v18, %v1179_v22 }
 0x8c7   : > { %v1184_v25 = vsel %vm1183_vm15, %v2087_v18, %v1180_v23 }
 0x8c8   : > { %v1185_v27 = vmul.f32 %v1184_v25, %v1168_v10 }
 0x8ca   : > { %v1189_v28 = vmul.f32 %v2052_v24, %v1185_v27 }
 0x8cc   : > { %v2407_v30 = vadd.f32 %v2053_v26, %v1189_v28 }
 0x8ce   : > { %v1194_v29 = vpack.c.bf16 %v2407_v30, %v2407_v30 }
 0x8d0   : > { %1915 = vmatmul.msk.bf16.vlgmr.msrb.gmra.mxu0 %vm644_vm0, %v1194_v29 }
 0x94d   : > { %v1229_v32 = vpop.f32.mrf.mxu0 }
 0x94e   : > { %v1230_v33 = vadd.f32 %v2054_v31, %v1229_v32 }
 0x950   : > { %1240 = vrot.lane.b32.xlu1 %v1230_v33, %s2121_s24  ;;  %1237 = vrot.lane.b32.xlu2 %v1230_v33, %s2596_s26  ;;  %v1243_v34 = vpack.c.bf16 %v1230_v33, %v1230_v33  ;;  %s2599_s24 = smov 64  }
 0x951   : > { %1234 = vrot.lane.b32.xlu0 %v1230_v33, %s2597_s3 }
 0x952   : > { %v1248_v35 = vunpack.c.l.b16 %v1243_v34 }
 0x954   : > { %v2418_v37 = vpack.c.b16 %v1248_v35, %v1248_v35 }
 0x955   : > { %v1231_v36 = vpop.f32.mrf.mxu0 }
 0x958   : > { %1250 = vrot.lane.b32.xlu1 %v2418_v37, %s2598_s30 }
 0x9aa   : > { %v1238_v42 = vpop.permute.xlu2 %1237 }
 0x9ab   : > { %v1245_v46 = vpack.c.bf16 %v1238_v42, %v1238_v42 }
 0x9ad   : > { %v1296_v49 = vunpack.c.l.b16 %v1245_v46 }
 0x9af   : > { %v1297_v50 = vpack.c.b16 %v1296_v49, %v1296_v49 }
 0x9c2   : > { %v1241_v38 = vpop.permute.xlu1 %1240 }
 0x9c3   : > { %v1246_v40 = vpack.c.bf16 %v1241_v38, %v1241_v38  ;;  %v1235_v41 = vpop.permute.xlu0 %1234 }
 0x9c4   : > { %v1244_v39 = vpack.c.bf16 %v1235_v41, %v1235_v41 }
 0x9c5   : > { %v1320_v43 = vunpack.c.l.b16 %v1246_v40 }
 0x9c6   : > { %v1272_v44 = vunpack.c.l.b16 %v1244_v39 }
 0x9c7   : > { %v1321_v45 = vpack.c.b16 %v1320_v43, %v1320_v43 }
 0x9c8   : > { %v2422_v47 = vpack.c.b16 %v1272_v44, %v1272_v44 }
 0x9c9   : > { %1322 = vrot.lane.b32.xlu2 %v1321_v45, %s2598_s30 }
 0x9ca   : > { %1274 = vrot.lane.b32.xlu0 %v2422_v47, %s2598_s30  ;;  %v1251_v48 = vpop.permute.xlu1 %1250 }
 0x9cb   : > { %v1256_v51 = vsel %vm738_vm5, %v1251_v48, 0 }
 0x9cc   : > { %1265 = vmatpush.bf16.xpose.msrb.mxu1 %v1256_v51 }
 0x9d2   : > { %1298 = vrot.lane.b32.xlu0 %v1297_v50, %s2598_s30 }
 0x9d3   : > { %1916 = vmatmul.msk.bf16.vlgmr.msrb.gmra.mxu1 %vm738_vm5, %v1243_v34 }
 0xa23   : > { %v1323_v52 = vpop.permute.xlu2 %1322 }
 0xa24   : > { %v1328_v53 = vsel %vm738_vm5, %v1323_v52, 0 }
 0xa25   : > { %1337 = vmatpush.bf16.xpose.msra.mxu0 %v1328_v53 }
 0xa2c   : > { %1919 = vmatmul.msk.bf16.vlgmr.msra.gmra.mxu0 %vm738_vm5, %v1246_v40 }
 0xa3c   : > { %v1275_v54 = vpop.permute.xlu0 %1274 }
 0xa3d   : > { %v1280_v55 = vsel %vm738_vm5, %v1275_v54, 0 }
 0xa3e   : > { %1289 = vmatpush.bf16.xpose.msrb.mxu2 %v1280_v55 }
 0xa44   : > { %v1299_v56 = vpop.permute.xlu0 %1298 }
 0xa45   : > { %v1304_v57 = vsel %vm738_vm5, %v1299_v56, 0  ;;  %1917 = vmatmul.msk.bf16.vlgmr.msrb.gmra.mxu2 %vm738_vm5, %v1244_v39 }
 0xa46   : > { %1313 = vmatpush.bf16.xpose.msrb.mxu3 %v1304_v57 }
 0xa4d   : > { %1918 = vmatmul.msk.bf16.vlgmr.msrb.gmra.mxu3 %vm738_vm5, %v1245_v46 }
 0xa50   : > { %v1267_v58 = vpop.f32.mrf.mxu1 }
 0xa51   : > { %v1343_v5 = vmul.f32 0.35355338, %v1267_v58 }
 0xa53   : > { %v1347_v11 = vadd.f32 %v2309_v59, %v1343_v5  ;;  %v2015_v5 = vld [vmem:[%s2559_s6 + $0x18] sm:$0xff] }
 0xa55   : > { %v1351_v14 = vsel %vm738_vm5, %v1347_v11, -inf }
 0xa58   : > { %v1269_v60 = vpop.f32.mrf.mxu1 }
 0xaa9   : > { %v1339_v61 = vpop.f32.mrf.mxu0 }
 0xaaa   : > { %v1346_v62 = vmul.f32 0.35355338, %v1339_v61 }
 0xaac   : > { %v1350_v63 = vadd.f32 %v2309_v59, %v1346_v62 }
 0xaae   : > { %v1360_v0 = vsel %vm738_vm5, %v1350_v63, -inf }
 0xaaf   : > { %1361 = vmax.xlane.f32.xlu1 %v1360_v0 }
 0xab1   : > { %v1341_v1 = vpop.f32.mrf.mxu0 }
 0xac8   : > { %v1291_v2 = vpop.f32.mrf.mxu2 }
 0xac9   : > { %v1344_v3 = vmul.f32 0.35355338, %v1291_v2 }
 0xacb   : > { %v1348_v4 = vadd.f32 %v2309_v59, %v1344_v3 }
 0xacd   : > { %v1354_v6 = vsel %vm738_vm5, %v1348_v4, -inf }
 0xace   : > { %1355 = vmax.xlane.f32.xlu0 %v1354_v6  ;;  %v2014_v6 = vld [vmem:[%s2559_s6 + $0x10] sm:$0xff] }
 0xad0   : > { %v1293_v7 = vpop.f32.mrf.mxu2  ;;  %v1315_v9 = vpop.f32.mrf.mxu3 }
 0xad1   : > { %v1345_v10 = vmul.f32 0.35355338, %v1315_v9 }
 0xad3   : > { %v1349_v12 = vadd.f32 %v2309_v59, %v1345_v10 }
 0xad5   : > { %v1357_v13 = vsel %vm738_vm5, %v1349_v12, -inf }
 0xad6   : > { %1358 = vmax.xlane.f32.xlu2 %v1357_v13  ;;  %1352 = vmax.xlane.f32.xlu0 %v1351_v14 }
 0xad8   : > { %v1317_v15 = vpop.f32.mrf.mxu3 }
 0xad9   : > { %v2055_v15 = vld [vmem:[%s2560_s7 + $0x1] ss:$0 sm:$0xff] }
 0xb22   : > { %v1362_v16 = vpop.xlane.xlu1 %1361 }
 0xb23   : > { %v1366_v17 = vsub.f32 %v1350_v63, %v1362_v16 }
 0xb25   : > { %v1373_v18 = vmul.f32 1.442695, %v1366_v17 }
 0xb27   : > { %2088 = vpow2.f32 %v1373_v18 }
 0xb2d   : > { %v2089_v19 = vpop.eup %2088 }
 0xb2e   : > { %v1384_v20 = vsel %vm738_vm5, %v2089_v19, 0.0 }
 0xb2f   : > { %1385 = vadd.xlane.f32.xlu0 %v1384_v20 }
 0xb41   : > { %v1356_v21 = vpop.xlane.xlu0 %1355 }
 0xb42   : > { %v1364_v22 = vsub.f32 %v1348_v4, %v1356_v21 }
 0xb43   : > { %1462 = vrot.lane.b32.xlu0 %v1321_v45, %s2599_s24 }
 0xb44   : > { %v1369_v59 = vmul.f32 1.442695, %v1364_v22 }
 0xb46   : > { %2090 = vpow2.f32 %v1369_v59 }
 0xb49   : > { %v1359_v23 = vpop.xlane.xlu2 %1358  ;;  %v1353_v31 = vpop.xlane.xlu0 %1352 }
 0xb4a   : > { %v1365_v24 = vsub.f32 %v1349_v12, %v1359_v23  ;;  %v1363_v32 = vsub.f32 %v1347_v11, %v1353_v31 }
 0xb4b   : > { %1399 = vrot.lane.b32.xlu0 %v2418_v37, %s2599_s24 }
 0xb4c   : > { %v2091_v25 = vpop.eup %2090  ;;  %v1371_v26 = vmul.f32 1.442695, %v1365_v24  ;;  %v1367_v33 = vmul.f32 1.442695, %v1363_v32 }
 0xb4d   : > { %v1378_v27 = vsel %vm738_vm5, %v2091_v25, 0.0 }
 0xb4e   : > { %2092 = vpow2.f32 %v1371_v26  ;;  %1379 = vadd.xlane.f32.xlu2 %v1378_v27 }
 0xb4f   : > { %2094 = vpow2.f32 %v1367_v33 }
 0xb54   : > { %v2093_v28 = vpop.eup %2092 }
 0xb55   : > { %v1381_v29 = vsel %vm738_vm5, %v2093_v28, 0.0  ;;  %v2095_v34 = vpop.eup %2094 }
 0xb56   : > { %1382 = vadd.xlane.f32.xlu1 %v1381_v29  ;;  %v1375_v35 = vsel %vm738_vm5, %v2095_v34, 0.0 }
 0xb66   : > { %1420 = vrot.lane.b32.xlu2 %v2422_v47, %s2599_s24 }
 0xb6f   : > { %1441 = vrot.lane.b32.xlu1 %v1297_v50, %s2599_s24 }
 0xb8f   : > { %1376 = vadd.xlane.f32.xlu2 %v1375_v35 }
 0xba2   : > { %v1386_v36 = vpop.xlane.xlu0 %1385 }
 0xba3   : > { %2096 = vrcp.f32 %v1386_v36  ;;  %v2056_v36 = vld [vmem:[%s2561_s8 + $0x1] ss:$0 sm:$0xff] }
 0xba9   : > { %v2097_v37 = vpop.eup %2096 }
 0xbaa   : > { %v1394_v38 = vmul.f32 %v2097_v37, %v2089_v19 }
 0xbac   : > { %v1398_v39 = vpack.c.bf16 %v1394_v38, %v1394_v38  ;;  %v2057_v38 = vld [vmem:[%s2562_s9 + $0x1] ss:$0 sm:$0xff] }
 0xbb5   : > { %v1463_v40 = vpop.permute.xlu0 %1462 }
 0xbb6   : > { %v1468_v41 = vsel %vm894_vm6, %v1463_v40, 0 }
 0xbb7   : > { %1477 = vmatpush.bf16.msrb.mxu0 %v1468_v41 }
 0xbba   : > { %1923 = vmatmul.msk.bf16.vlgmr.msrb.gmra.mxu0 %vm738_vm5, %v1398_v39 }
 0xbbd   : > { %v1400_v42 = vpop.permute.xlu0 %1399 }
 0xbbe   : > { %v1405_v43 = vsel %vm894_vm6, %v1400_v42, 0 }
 0xbbf   : > { %1414 = vmatpush.bf16.msra.mxu1 %v1405_v43  ;;  %v2021_v43 = vld [vmem:[%s2565_s12 + $0x38] sm:$0xff] }
 0xbc1   : > { %v1380_v44 = vpop.xlane.xlu2 %1379 }
 0xbc2   : > { %2098 = vrcp.f32 %v1380_v44  ;;  %v2020_v44 = vld [vmem:[%s2565_s12 + $0x30] sm:$0xff] }
 0xbc3   : > { %1530 = vmatpush.bf16.msrb.mxu1 %v2015_v5 }
 0xbc7   : > { %1531 = vmatpush.bf16.msrb.mxu1 %v2014_v6 }
 0xbc8   : > { %v2099_v45 = vpop.eup %2098 }
 0xbc9   : > { %v1392_v46 = vmul.f32 %v2099_v45, %v2091_v25  ;;  %v1421_v47 = vpop.permute.xlu2 %1420  ;;  %v1383_v49 = vpop.xlane.xlu1 %1382  ;;  %v2017_v25 = vld [vmem:[%s2563_s10 + $0x18] sm:$0xff]  ;;  %v2019_v45 = vld [vmem:[%s2565_s12 + $0x28] sm:$0xff] }
 0xbca   : > { %v1426_v48 = vsel %vm894_vm6, %v1421_v47, 0  ;;  %2100 = vrcp.f32 %v1383_v49  ;;  %v2058_v47 = vld [vmem:[%s2564_s11 + $0x1] ss:$0 sm:$0xff] }
 0xbcb   : > { %v1396_v51 = vpack.c.bf16 %v1392_v46, %v1392_v46  ;;  %1435 = vmatpush.bf16.msra.mxu2 %v1426_v48  ;;  %v2018_v46 = vld [vmem:[%s2565_s12 + $0x20] sm:$0xff] }
 0xbce   : > { %1921 = vmatmul.msk.bf16.vlgmr.msra.gmra.mxu2 %vm738_vm5, %v1396_v51 }
 0xbcf   : > { %1604 = vmatpush.bf16.msrb.mxu2 %v2017_v25 }
 0xbd0   : > { %v2101_v50 = vpop.eup %2100 }
 0xbd1   : > { %v1393_v52 = vmul.f32 %v2101_v50, %v2093_v28 }
 0xbd3   : > { %v1397_v55 = vpack.c.bf16 %v1393_v52, %v1393_v52 }
 0xbe1   : > { %v1442_v53 = vpop.permute.xlu1 %1441 }
 0xbe2   : > { %v1447_v54 = vsel %vm894_vm6, %v1442_v53, 0 }
 0xbe3   : > { %1456 = vmatpush.bf16.msra.mxu3 %v1447_v54 }
 0xbe6   : > { %1922 = vmatmul.msk.bf16.vlgmr.msra.gmra.mxu3 %vm738_vm5, %v1397_v55 }
 0xbe7   : > { %1666 = vmatpush.bf16.msrb.mxu3 %v2021_v43 }
 0xbeb   : > { %1667 = vmatpush.bf16.msrb.mxu3 %v2020_v44 }
 0xbef   : > { %1668 = vmatpush.bf16.msrb.mxu3 %v2019_v45 }
 0xbf3   : > { %1669 = vmatpush.bf16.msrb.mxu3 %v2018_v46 }
 0xc02   : > { %v1377_v56 = vpop.xlane.xlu2 %1376 }
 0xc03   : > { %2102 = vrcp.f32 %v1377_v56 }
 0xc09   : > { %v2103_v57 = vpop.eup %2102 }
 0xc0a   : > { %v1391_v58 = vmul.f32 %v2103_v57, %v2095_v34 }
 0xc0c   : > { %v1395_v60 = vpack.c.bf16 %v1391_v58, %v1391_v58 }
 0xc0e   : > { %1920 = vmatmul.msk.bf16.vlgmr.msra.gmra.mxu1 %vm738_vm5, %v1395_v60 }
 0xc37   : > { %v1479_v61 = vpop.f32.mrf.mxu0 }
 0xc3f   : > { %v1481_v62 = vpop.f32.mrf.mxu0 }
 0xc40   : > { %v2059_v62 = vld [vmem:[%s2566_s13 + $0x1] ss:$0 sm:$0xff] }
 0xc51   : > { %v1437_v63 = vpop.f32.mrf.mxu2 }
 0xc52   : > { %1484 = vrot.lane.b32.xlu1 %v1437_v63, %s2600_s21 }
 0xc59   : > { %v1439_v0 = vpop.f32.mrf.mxu2 }
 0xc5a   : > { %1492 = vrot.lane.b32.xlu1 %v1479_v61, %s2601_s23  ;;  %s2603_s23 = sshll.u32 %s2605_s22, 3 }
 0xc5b   : > { %s638_s4 = scalar_lea.vmem %s2573_s20, %s2603_s23 }
 0xc69   : > { %v1458_v1 = vpop.f32.mrf.mxu3 }
 0xc6a   : > { %1488 = vrot.lane.b32.xlu0 %v1458_v1, %s2602_s29 }
 0xc71   : > { %v1460_v2 = vpop.f32.mrf.mxu3 }
 0xc8b   : > { %v1416_v3 = vpop.f32.mrf.mxu1 }
 0xc93   : > { %v1418_v4 = vpop.f32.mrf.mxu1 }
 0xcc4   : > { %v1485_v7 = vpop.permute.xlu1 %1484 }
 0xcc5   : > { %v1495_v9 = vsel %vm738_vm5, %v1416_v3, %v1485_v7 }
 0xccc   : > { %v1493_v11 = vpop.permute.xlu1 %1492 }
 0xcdc   : > { %v1489_v10 = vpop.permute.xlu0 %1488 }
 0xcdd   : > { %v1496_v12 = vsel %vm987_vm7, %v1495_v9, %v1489_v10  ;;  %v2023_v10 = vld [vmem:[%s2569_s16 + $0x8] sm:$0xff] }
 0xcde   : > { %v1497_v13 = vsel %vm989_vm8, %v1496_v12, %v1493_v11  ;;  %1737 = vmatpush.bf16.msra.mxu0 %v2023_v10  ;;  %v2022_v11 = vld [vmem:[%s2569_s16] sm:$0xff] }
 0xcdf   : > { %v1498_v14 = vpack.c.bf16 %v1497_v13, %v1497_v13 }
 0xce1   : > { %1937 = vmatmul.msk.bf16.vlgmr.msrb.gmra.mxu1 %vm644_vm0, %v1498_v14 }
 0xce2   : > { %1738 = vmatpush.bf16.msra.mxu0 %v2022_v11 }
 0xd5e   : > { %v1533_v16 = vpop.f32.mrf.mxu1 }
 0xd5f   : > { %v1534_v17 = vadd.f32 %v2055_v15, %v1533_v16 }
 0xd61   : > { %v1537_v18 = vadd.f32 %v1534_v17, %v2407_v30  ;;  %v2016_v30 = vld [vmem:[%s2563_s10 + $0x10] sm:$0xff] }
 0xd62   : > { %1605 = vmatpush.bf16.msrb.mxu2 %v2016_v30  ;;  %v2025_v30 = vld [vmem:[%s2571_s18 + $0x8] sm:$0xff] }
 0xd63   : > { %v1542_v19 = vsel %vm644_vm0, %v1537_v18, 0.0  ;;  %1772 = vmatpush.bf16.msra.mxu1 %v2025_v30 }
 0xd64   : > { %1543 = vadd.xlane.f32.xlu0 %v1542_v19 }
 0xd66   : > { %v1535_v20 = vpop.f32.mrf.mxu1 }
 0xdd7   : > { %v1544_v21 = vpop.xlane.xlu0 %1543 }
 0xdd8   : > { %v1545_v22 = vmul.f32 %v1544_v21, %v2255_v8  ;;  %v2060_v21 = vld [vmem:[%s2567_s14 + $0x1] ss:$0 sm:$0xff] }
 0xdda   : > { %v1546_v59 = vsub.f32 %v1537_v18, %v1545_v22 }
 0xddc   : > { %v1547_v23 = vmul.f32 %v1546_v59, %v1546_v59 }
 0xdde   : > { %v1548_v24 = vsel %vm644_vm0, %v1547_v23, 0.0 }
 0xddf   : > { %1549 = vadd.xlane.f32.xlu1 %v1548_v24 }
 0xe52   : > { %v1550_v26 = vpop.xlane.xlu1 %1549 }
 0xe53   : > { %v1551_v27 = vmul.f32 %v1550_v26, %v2255_v8  ;;  %v2024_v26 = vld [vmem:[%s2571_s18] sm:$0xff] }
 0xe54   : > { %1773 = vmatpush.bf16.msra.mxu1 %v2024_v26 }
 0xe55   : > { %v1552_v28 = vadd.f32 1e-12, %v1551_v27  ;;  %v1715_v27 = vld [vmem:[%s2570_s17] sm:$0x1] }
 0xe57   : > { %2104 = vrsqrt.f32 %v1552_v28  ;;  %vm1559_vm2 = vweird.f32 %v1552_v28 }
 0xe5d   : > { %v2105_v29 = vpop.eup %2104 }
 0xe5e   : > { %v1554_v31 = vmul.f32 %v2105_v29, %v1552_v28  ;;  %vm1560_vm1 = vweird.f32 %v2105_v29 }
 0xe5f   : > { %vm1561_vm3 = vmor %vm1559_vm2, %vm1560_vm1 }
 0xe60   : > { %v1555_v32 = vmul.f32 %v2105_v29, %v1554_v31 }
 0xe62   : > { %v1556_v33 = vmul.f32 0.5, %v1555_v32 }
 0xe64   : > { %v1557_v34 = vsub.f32 1.5, %v1556_v33 }
 0xe66   : > { %v1558_v35 = vmul.f32 %v2105_v29, %v1557_v34  ;;  %v1750_v34 = vld [vmem:[%s2572_s19] sm:$0x1] }
 0xe68   : > { %v1562_v37 = vsel %vm1561_vm3, %v2105_v29, %v1558_v35 }
 0xe69   : > { %v1563_v40 = vmul.f32 %v1562_v37, %v1546_v59 }
 0xe6b   : > { %v1567_v41 = vmul.f32 %v2056_v36, %v1563_v40 }
 0xe6d   : > { %v1571_v39 = vadd.f32 %v2057_v38, %v1567_v41 }
 0xe6f   : > { %v1572_v42 = vpack.c.bf16 %v1571_v39, %v1571_v39 }
 0xe71   : > { %1953 = vmatmul.msk.bf16.vlgmr.msrb.gmra.mxu2 %vm644_vm0, %v1572_v42 }
 0xef4   : > { %v1607_v48 = vpop.f32.mrf.mxu2 }
 0xef5   : > { %v1608_v51 = vadd.f32 %v2058_v47, %v1607_v48 }
 0xef7   : > { %v1612_v49 = vmul.f32 0.044715, %v1608_v51  ;;  %v1611_v57 = vmul.f32 0.5, %v1608_v51 }
 0xef9   : > { %v1613_v50 = vmul.f32 %v1612_v49, %v1608_v51 }
 0xefb   : > { %v1614_v52 = vmul.f32 %v1613_v50, %v1608_v51 }
 0xefc   : > { %v1609_v53 = vpop.f32.mrf.mxu2 }
 0xefd   : > { %v1615_v54 = vadd.f32 %v1614_v52, %v1608_v51 }
 0xeff   : > { %v1616_v55 = vmul.f32 0.7978846, %v1615_v54 }
 0xf01   : > { %2106 = vtanh.f32 %v1616_v55 }
 0xf07   : > { %v2107_v56 = vpop.eup %2106 }
 0xf08   : > { %v1618_v58 = vadd.f32 1.0, %v2107_v56 }
 0xf0a   : > { %v1619_v60 = vmul.f32 %v1618_v58, %v1611_v57 }
 0xf0c   : > { %v1620_v61 = vpack.c.bf16 %v1619_v60, %v1619_v60 }
 0xf0e   : > { %1979 = vmatmul.msk.bf16.vlgmr.msrb.gmra.mxu3 %vm1144_vm12, %v1620_v61 }
 0xf91   : > { %v1671_v63 = vpop.f32.mrf.mxu3 }
 0xf92   : > { %v1672_v0 = vadd.f32 %v2059_v62, %v1671_v63 }
 0xf94   : > { %v1675_v1 = vadd.f32 %v1672_v0, %v1571_v39 }
 0xf96   : > { %v1680_v2 = vsel %vm644_vm0, %v1675_v1, 0.0 }
 0xf97   : > { %1681 = vadd.xlane.f32.xlu2 %v1680_v2 }
 0xf99   : > { %v1673_v3 = vpop.f32.mrf.mxu3 }
0x100a   : > { %v1682_v4 = vpop.xlane.xlu2 %1681 }
0x100b   : > { %v1683_v5 = vmul.f32 %v1682_v4, %v2255_v8 }
0x100d   : > { %v1684_v6 = vsub.f32 %v1675_v1, %v1683_v5 }
0x100f   : > { %v1685_v7 = vmul.f32 %v1684_v6, %v1684_v6 }
0x1011   : > { %v1686_v9 = vsel %vm644_vm0, %v1685_v7, 0.0 }
0x1012   : > { %1687 = vadd.xlane.f32.xlu2 %v1686_v9 }
0x1085   : > { %v1688_v12 = vpop.xlane.xlu2 %1687 }
0x1086   : > { %v1689_v13 = vmul.f32 %v1688_v12, %v2255_v8  ;;  %v2061_v8 = vld [vmem:[%s2568_s15 + $0x1] ss:$0 sm:$0xff] }
0x1088   : > { %v1690_v14 = vadd.f32 1e-12, %v1689_v13 }
0x108a   : > { %2108 = vrsqrt.f32 %v1690_v14  ;;  %vm1697_vm5 = vweird.f32 %v1690_v14 }
0x1090   : > { %v2109_v15 = vpop.eup %2108 }
0x1091   : > { %v1692_v16 = vmul.f32 %v2109_v15, %v1690_v14  ;;  %vm1698_vm4 = vweird.f32 %v2109_v15 }
0x1092   : > { %vm1699_vm6 = vmor %vm1697_vm5, %vm1698_vm4 }
0x1093   : > { %v1693_v17 = vmul.f32 %v2109_v15, %v1692_v16 }
0x1095   : > { %v1694_v18 = vmul.f32 0.5, %v1693_v17 }
0x1097   : > { %v1695_v19 = vsub.f32 1.5, %v1694_v18 }
0x1099   : > { %v1696_v20 = vmul.f32 %v2109_v15, %v1695_v19 }
0x109b   : > { %v1700_v22 = vsel %vm1699_vm6, %v2109_v15, %v1696_v20 }
0x109c   : > { %v1701_v59 = vmul.f32 %v1700_v22, %v1684_v6 }
0x109e   : > { %v1705_v23 = vmul.f32 %v2060_v21, %v1701_v59 }
0x10a0   : > { %v1709_v24 = vadd.f32 %v2061_v8, %v1705_v23 }
0x10a2   : > { %v1710_v25 = vpack.c.bf16 %v1709_v24, %v1709_v24 }
0x10a4   : > { %1990 = vmatmul.msk.bf16.vlgmr.msra.gmra.mxu0 %vm644_vm0, %v1710_v25 }
0x1121   : > { %v1740_v28 = vpop.f32.mrf.mxu0 }
0x1122   : > { %v1741_v29 = vadd.f32 %v1740_v28, %v1715_v27 }
0x1124   : > { %2110 = vtanh.f32 %v1741_v29 }
0x1129   : > { %v1742_v31 = vpop.f32.mrf.mxu0 }
0x112a   : > { %v2111_v32 = vpop.eup %2110 }
0x112b   : > { %v1745_v33 = vpack.c.bf16 %v2111_v32, %v2111_v32 }
0x112d   : > { %1999 = vmatmul.msk.bf16.vlgmr.msra.gmra.mxu1 %vm644_vm0, %v1745_v33 }
0x11aa   : > { %v1775_v35 = vpop.f32.mrf.mxu1 }
0x11ab   : > { %v1776_v36 = vadd.f32 %v1775_v35, %v1750_v34 }
0x11ad   : > { %v1779_v37 = vperm.slane %v1776_v36, 0 }
0x11af   : > { %1780 = vst [vmem:[%s638_s4] sm:$0xff] %v1779_v37 }
0x11b2   : > { %v1777_v38 = vpop.f32.mrf.mxu1 }
0x11b3 PF: > { %s30_s1 = sadd.s32 1, %s2118_s1  }
0x11b4   : > { %p27_p4 = scmp.ge.s32.totalorder %s30_s1, 4  }
0x11b6   :  { %29 = sbr.rel (!%p27_p4) target bundleno = 6 (0x6), region = 145 }

</bundles_post_ra>
